<compile_context>
chip_gen: v7x
topology: tpu7x:2x2x1
jax: 0.10.0
libtpu: 0.0.40
codegen_flags: <defaults>
</compile_context>

<pallas_src>
import math

import jax
import jax.numpy as jnp
from jax import lax
from jax.experimental import pallas as pl
from jax.experimental.pallas import tpu as pltpu

# ----------------------------- hyperparameters ------------------------------
OUT_CHANNELS = 1
HIDDEN = 32          # hidden_channels
FILTER = 64          # filter_channels
N_HEADS = 2
N_LAYERS = 2
KERNEL_SIZE = 3      # FFN kernel size (causal)
SPK_CHANNELS = 16
B = 2
T = 16
K_CH = HIDDEN // N_HEADS
EPS = 1e-5           # attentions.LayerNorm eps
LANES = 128          # lane-dense padded width for vectors / output

# -------------------- packed parameter layout (static) ----------------------
# w_front (bf16): (FR_ROWS, HIDDEN)
FR_COND = 0                          # cond 1x1 conv weight (SPK_CHANNELS rows)
FR_PRE = SPK_CHANNELS                # prenet conv3 weight stacked (3*HIDDEN rows)
FR_ROWS = FR_PRE + 3 * HIDDEN        # = 112

# vecs (f32): (V_ROWS, LANES), each row one (1, C) vector zero-padded to 128 lanes
V_COND_B, V_F0P_B, V_PRE_B, V_PROJ_B = 0, 1, 2, 3
V_F0T0, V_F0T1, V_F0T2 = 4, 5, 6      # f0_prenet taps (Cin = 1 -> elementwise)
V_LAYER0, V_STRIDE = 8, 8
VO_QKV_B, VO_O_B, VO_N0G, VO_N0B, VO_F1B, VO_F2B, VO_N1G, VO_N1B = range(8)
V_PROJ_W = V_LAYER0 + N_LAYERS * V_STRIDE   # = 24 (8-aligned padded proj weight block)
V_ROWS = V_PROJ_W + HIDDEN                  # = 56


# ------------------------------ kernel helpers ------------------------------
def _layer_norm(x, gamma, beta):
    # LayerNorm over the channel axis (last axis in our layout), f32.
    mu = jnp.mean(x, axis=-1, keepdims=True)
    var = jnp.mean((x - mu) ** 2, axis=-1, keepdims=True)
    return (x - mu) * lax.rsqrt(var + EPS) * gamma + beta


# --------------------------------- kernel -----------------------------------
def f0_decoder_kernel(
    x_ref, f0_ref, mask_ref, spk_ref,
    w_front_ref, vecs_ref, w_qkvo_ref, w_f1_ref, w_f2_ref,
    out_ref,
):
    bf = jnp.bfloat16
    f32 = jnp.float32

    x = x_ref[...]          # (T, HIDDEN) f32
    f0 = f0_ref[...]        # (T, 1) f32
    mask = mask_ref[...]    # (T, 1) f32
    spk = spk_ref[...]      # (1, SPK_CHANNELS) f32
    vecs = vecs_ref[...]    # (V_ROWS, LANES) f32 — loaded ONCE, value-sliced below

    # ---- hoisted iotas / masks (reused across layers; JAX does not CSE these) ----
    tpos = lax.broadcasted_iota(jnp.int32, (T, 1), 0)
    m_ge1 = tpos >= 1
    m_ge2 = tpos >= 2
    m_lt1 = tpos < T - 1
    rr = lax.broadcasted_iota(jnp.int32, (T, T), 0)
    cc = lax.broadcasted_iota(jnp.int32, (T, T), 1)
    causal = cc <= rr                       # commons.subsequent_mask per batch
    neg_fill = jnp.float32(-1e4)

    def sdown(v, s, m):     # v[t - s], zero where t - s < 0
        return jnp.where(m, pltpu.roll(v, shift=s, axis=0), 0.0)

    def sup(v, s, m):       # v[t + s], zero where t + s >= T
        return jnp.where(m, pltpu.roll(v, shift=T - s, axis=0), 0.0)

    def vrow(r, width):     # one packed (1, width) f32 vector from the vecs slab
        return vecs[r:r + 1, 0:width]

    # ---- x = x + cond(spk_emb)  (1x1 conv, broadcast over time) ----
    cond = jnp.dot(spk.astype(bf), w_front_ref[FR_COND:FR_COND + SPK_CHANNELS, :],
                   preferred_element_type=f32) + vrow(V_COND_B, HIDDEN)       # (1, H)
    x = x + cond

    # ---- x += f0_prenet(norm_f0)  (Conv1d(1, H, 3, padding=1); Cin=1 -> taps) ----
    x = x + (sdown(f0 * vrow(V_F0T0, HIDDEN), 1, m_ge1)
             + f0 * vrow(V_F0T1, HIDDEN)
             + sup(f0 * vrow(V_F0T2, HIDDEN), 1, m_lt1)
             + vrow(V_F0P_B, HIDDEN))

    # ---- x = prenet(x) * x_mask  (Conv1d(H, H, 3, pad=1) as 3 per-tap matmuls) ----
    taps_pre = [sdown(x, 1, m_ge1), x, sup(x, 1, m_lt1)]
    pre = vrow(V_PRE_B, HIDDEN)
    for j in range(KERNEL_SIZE):
        w_tap = w_front_ref[FR_PRE + j * HIDDEN:FR_PRE + (j + 1) * HIDDEN, :]
        pre = pre + jnp.dot(taps_pre[j].astype(bf), w_tap, preferred_element_type=f32)
    x = pre * mask

    # ----------------------- decoder = attentions.FFT -----------------------
    x = x * mask
    for l in range(N_LAYERS):
        base = V_LAYER0 + l * V_STRIDE

        # --- MultiHeadAttention: fused [Wq/sqrt(d) | Wk | Wvo_0 | Wvo_1] (H,4H) ---
        w_qkvo = w_qkvo_ref[l]                                         # (H, 4H) bf16
        qkvo = (jnp.dot(x.astype(bf), w_qkvo, preferred_element_type=f32)
                + vecs[base + VO_QKV_B:base + VO_QKV_B + 1, :])        # (T, 128) f32
        heads = jnp.zeros((T, HIDDEN), f32)
        for h in range(N_HEADS):
            q_h = qkvo[:, h * K_CH:(h + 1) * K_CH]
            k_h = qkvo[:, HIDDEN + h * K_CH:HIDDEN + (h + 1) * K_CH]
            vo_h = qkvo[:, 2 * HIDDEN + h * HIDDEN:2 * HIDDEN + (h + 1) * HIDDEN]
            scores = lax.dot_general(q_h.astype(bf), k_h.astype(bf),
                                     (((1,), (1,)), ((), ())),
                                     preferred_element_type=f32)        # (T, T)
            scores = jnp.where(causal, scores, neg_fill)
            m_row = jnp.max(scores, axis=-1, keepdims=True)
            e = jnp.exp(scores - m_row)
            p = e * pl.reciprocal(jnp.sum(e, axis=-1, keepdims=True), approx=True)
            heads = heads + jnp.dot(p.astype(bf), vo_h.astype(bf),
                                    preferred_element_type=f32)
        y = heads + vrow(base + VO_O_B, HIDDEN)        # bias = b_o + b_v @ W_o (folded)
        x = _layer_norm(x + y, vrow(base + VO_N0G, HIDDEN), vrow(base + VO_N0B, HIDDEN))

        # --- FFN: two causal conv3 as per-tap matmuls, relu ---
        xm = x * mask
        w1 = w_f1_ref[l]                                # (3*H, FILTER) bf16
        w2 = w_f2_ref[l]                                # (3*FILTER, H) bf16
        taps1 = [sdown(xm, 2, m_ge2), sdown(xm, 1, m_ge1), xm]
        h1 = vrow(base + VO_F1B, FILTER)
        for j in range(KERNEL_SIZE):
            h1 = h1 + jnp.dot(taps1[j].astype(bf),
                              w1[j * HIDDEN:(j + 1) * HIDDEN, :],
                              preferred_element_type=f32)
        h1 = jnp.maximum(h1, 0.0) * mask
        taps2 = [sdown(h1, 2, m_ge2), sdown(h1, 1, m_ge1), h1]
        y = vrow(base + VO_F2B, HIDDEN)
        for j in range(KERNEL_SIZE):
            y = y + jnp.dot(taps2[j].astype(bf),
                            w2[j * FILTER:(j + 1) * FILTER, :],
                            preferred_element_type=f32)
        y = y * mask
        x = _layer_norm(x + y, vrow(base + VO_N1G, HIDDEN), vrow(base + VO_N1B, HIDDEN))

    x = x * mask

    # ---- x = proj(x) * x_mask  (Conv1d(H, 1, 1); weight zero-padded to 128 lanes
    #      so the store is a lane-dense unmasked slab; only column 0 is real) ----
    proj_w = vecs[V_PROJ_W:V_PROJ_W + HIDDEN, :]
    out = (jnp.dot(x.astype(bf), proj_w.astype(bf), preferred_element_type=f32)
           + vecs[V_PROJ_B:V_PROJ_B + 1, :])
    out_ref[...] = out * mask


# -------------------------------- wrapper ------------------------------------
@jax.jit
def f0_decoder_forward(x_bth, norm_f0_bt1, x_mask_bt1, spk_emb_bs, packed):
    """Inputs in (B, T, C) layout (== PyTorch (B, C, T) transposed):
       x (B,T,HIDDEN), norm_f0 (B,T,1), x_mask (B,T,1), spk_emb (B,SPK_CHANNELS).
       Returns (B, T, OUT_CHANNELS)."""
    w_front, vecs, w_qkvo, w_f1, w_f2 = packed
    spk = spk_emb_bs.reshape(B, 1, SPK_CHANNELS)
    out = pl.pallas_call(
        f0_decoder_kernel,
        out_shape=jax.ShapeDtypeStruct((B, T, LANES), jnp.float32),
        grid=(B,),
        in_specs=[
            pl.BlockSpec((None, T, HIDDEN), lambda b: (b, 0, 0)),          # x
            pl.BlockSpec((None, T, 1), lambda b: (b, 0, 0)),               # norm_f0
            pl.BlockSpec((None, T, 1), lambda b: (b, 0, 0)),               # x_mask
            pl.BlockSpec((None, 1, SPK_CHANNELS), lambda b: (b, 0, 0)),    # spk_emb
            # weights: constant index maps -> stay VMEM-resident across grid steps
            pl.BlockSpec((FR_ROWS, HIDDEN), lambda b: (0, 0)),
            pl.BlockSpec((V_ROWS, LANES), lambda b: (0, 0)),
            pl.BlockSpec((N_LAYERS, HIDDEN, 4 * HIDDEN), lambda b: (0, 0, 0)),
            pl.BlockSpec((N_LAYERS, KERNEL_SIZE * HIDDEN, FILTER), lambda b: (0, 0, 0)),
            pl.BlockSpec((N_LAYERS, KERNEL_SIZE * FILTER, HIDDEN), lambda b: (0, 0, 0)),
        ],
        out_specs=pl.BlockSpec((None, T, LANES), lambda b: (b, 0, 0)),
        compiler_params=pltpu.CompilerParams(
            dimension_semantics=("parallel",)),
    )(x_bth, norm_f0_bt1, x_mask_bt1, spk, w_front, vecs, w_qkvo, w_f1, w_f2)
    return out[:, :, :OUT_CHANNELS]


def init_params(key):
    """Deterministic synthetic parameters in 'module' layout (conv w: (k, Cin, Cout)).
    # TODO(synk): real PyTorch Conv1d weights are (Cout, Cin, k); permute to
    # (k, Cin, Cout) (and Linear-style (in, out) for 1x1 convs) before pack_params."""
    ks = iter(jax.random.split(key, 64))

    def nrm(shape, scale=0.1):
        return scale * jax.random.normal(next(ks), shape, dtype=jnp.float32)

    L = N_LAYERS
    qw = nrm((L, HIDDEN, HIDDEN))
    qb = nrm((L, 1, HIDDEN), 0.01)
    return dict(
        cond_w=nrm((SPK_CHANNELS, HIDDEN)), cond_b=nrm((1, HIDDEN), 0.01),
        f0p_w=nrm((3, 1, HIDDEN)), f0p_b=nrm((1, HIDDEN), 0.01),
        pre_w=nrm((3, HIDDEN, HIDDEN)), pre_b=nrm((1, HIDDEN), 0.01),
        qw=qw, qb=qb,
        kw=qw, kb=qb,                 # proximal_init=True: conv_k starts as copy of conv_q
        vw=nrm((L, HIDDEN, HIDDEN)), vb=nrm((L, 1, HIDDEN), 0.01),
        ow=nrm((L, HIDDEN, HIDDEN)), ob=nrm((L, 1, HIDDEN), 0.01),
        n0g=jnp.ones((L, 1, HIDDEN), jnp.float32),
        n0b=jnp.zeros((L, 1, HIDDEN), jnp.float32),
        f1w=nrm((L, KERNEL_SIZE, HIDDEN, FILTER)), f1b=nrm((L, 1, FILTER), 0.01),
        f2w=nrm((L, KERNEL_SIZE, FILTER, HIDDEN)), f2b=nrm((L, 1, HIDDEN), 0.01),
        n1g=jnp.ones((L, 1, HIDDEN), jnp.float32),
        n1b=jnp.zeros((L, 1, HIDDEN), jnp.float32),
        proj_w=nrm((HIDDEN, OUT_CHANNELS)), proj_b=nrm((1, OUT_CHANNELS), 0.01),
    )


def pack_params(p):
    """Pack module tensors into 5 kernel-layout arrays (done once, offline).
    Folds: W_v @ W_o per head into W_vo (fused into the QKV slab), b_v @ W_o into
    the attention output bias, and 1/sqrt(d_k) into W_q / b_q. Matmul weights bf16."""
    L = N_LAYERS
    inv_sqrt_k = jnp.float32(1.0 / math.sqrt(K_CH))

    # matmul-weight front slab: cond 1x1 weight + prenet per-tap weights
    w_front = jnp.concatenate(
        [p["cond_w"], p["pre_w"].reshape(3 * HIDDEN, HIDDEN)], axis=0
    ).astype(jnp.bfloat16)
    assert w_front.shape == (FR_ROWS, HIDDEN)

    # fused per-layer [Wq/sqrt(d) | Wk | Wvo_0 | Wvo_1]  -> (L, H, 4H)
    qkvo = []
    for l in range(L):
        vo = [p["vw"][l][:, h * K_CH:(h + 1) * K_CH]
              @ p["ow"][l][h * K_CH:(h + 1) * K_CH, :] for h in range(N_HEADS)]
        qkvo.append(jnp.concatenate(
            [p["qw"][l] * inv_sqrt_k, p["kw"][l]] + vo, axis=1))
    w_qkvo = jnp.stack(qkvo, axis=0).astype(jnp.bfloat16)
    assert w_qkvo.shape == (L, HIDDEN, 4 * HIDDEN)

    w_f1 = p["f1w"].reshape(L, KERNEL_SIZE * HIDDEN, FILTER).astype(jnp.bfloat16)
    w_f2 = p["f2w"].reshape(L, KERNEL_SIZE * FILTER, HIDDEN).astype(jnp.bfloat16)

    def row(v):
        v = jnp.asarray(v, jnp.float32).reshape(1, -1)
        return jnp.pad(v, ((0, 0), (0, LANES - v.shape[1])))

    rows = [None] * V_PROJ_W
    rows[V_COND_B] = row(p["cond_b"])
    rows[V_F0P_B] = row(p["f0p_b"])
    rows[V_PRE_B] = row(p["pre_b"])
    rows[V_PROJ_B] = row(p["proj_b"])
    rows[V_F0T0] = row(p["f0p_w"][0])
    rows[V_F0T1] = row(p["f0p_w"][1])
    rows[V_F0T2] = row(p["f0p_w"][2])
    for l in range(L):
        base = V_LAYER0 + l * V_STRIDE
        rows[base + VO_QKV_B] = row(jnp.concatenate(
            [p["qb"][l] * inv_sqrt_k, p["kb"][l],
             jnp.zeros((1, 2 * HIDDEN), jnp.float32)], axis=1))
        rows[base + VO_O_B] = row(p["ob"][l] + p["vb"][l] @ p["ow"][l])   # fold b_v@W_o
        rows[base + VO_N0G] = row(p["n0g"][l])
        rows[base + VO_N0B] = row(p["n0b"][l])
        rows[base + VO_F1B] = row(p["f1b"][l])
        rows[base + VO_F2B] = row(p["f2b"][l])
        rows[base + VO_N1G] = row(p["n1g"][l])
        rows[base + VO_N1B] = row(p["n1b"][l])
    zero_row = jnp.zeros((1, LANES), jnp.float32)
    rows = [r if r is not None else zero_row for r in rows]
    proj_w = jnp.pad(p["proj_w"], ((0, 0), (0, LANES - OUT_CHANNELS)))     # (H, 128)
    vecs = jnp.concatenate(rows + [proj_w], axis=0)
    assert vecs.shape == (V_ROWS, LANES)
    return (w_front, vecs, w_qkvo, w_f1, w_f2)


if __name__ == "__main__":
    key = jax.random.PRNGKey(0)
    k_param, k_x, k_f0, k_spk = jax.random.split(key, 4)

    packed = pack_params(init_params(k_param))

    # activations in (B, T, C) layout — no wrapper transposes needed
    x = jax.random.normal(k_x, (B, T, HIDDEN), dtype=jnp.float32)
    norm_f0 = jax.random.normal(k_f0, (B, T, 1), dtype=jnp.float32)
    spk_emb = jax.random.normal(k_spk, (B, SPK_CHANNELS), dtype=jnp.float32)
    lengths = jnp.array([T, T - 4], dtype=jnp.int32)
    x_mask = (jnp.arange(T)[None, :] < lengths[:, None]).astype(jnp.float32)[:, :, None]

    out = f0_decoder_forward(x, norm_f0, x_mask, spk_emb, packed)
    out = jax.block_until_ready(out)

    assert out.shape == (B, T, OUT_CHANNELS), out.shape
    assert bool(jnp.all(jnp.isfinite(out)))
    print("KERNEL_OK")
</pallas_src>

<mosaic_0001>
module attributes {stable_mosaic.version = 11 : i64} {
  func.func @f0_decoder_kernel(%arg0: i32, %arg1: memref<1x16x32xf32, #tpu.memory_space<vmem>>, %arg2: memref<1x16x1xf32, #tpu.memory_space<vmem>>, %arg3: memref<1x16x1xf32, #tpu.memory_space<vmem>>, %arg4: memref<1x1x16xf32, #tpu.memory_space<vmem>>, %arg5: memref<112x32xbf16, #tpu.memory_space<vmem>>, %arg6: memref<56x128xf32, #tpu.memory_space<vmem>>, %arg7: memref<2x32x128xbf16, #tpu.memory_space<vmem>>, %arg8: memref<2x96x64xbf16, #tpu.memory_space<vmem>>, %arg9: memref<2x192x32xbf16, #tpu.memory_space<vmem>>, %arg10: memref<1x16x128xf32, #tpu.memory_space<vmem>>) attributes {dimension_semantics = [#tpu.dimension_semantics<parallel>], iteration_bounds = array<i64: 2>, scalar_prefetch = 0 : i64, scratch_operands = 0 : i64, tpu.core_type = #tpu.core_type<tc>, window_params = [{transform_indices = @transform_0, window_bounds = array<i64: 1, 16, 32>}, {transform_indices = @transform_1, window_bounds = array<i64: 1, 16, 1>}, {transform_indices = @transform_2, window_bounds = array<i64: 1, 16, 1>}, {transform_indices = @transform_3, window_bounds = array<i64: 1, 1, 16>}, {pipeline_mode = #tpu.pipeline_mode<synchronous>, transform_indices = @transform_4, window_bounds = array<i64: 112, 32>}, {pipeline_mode = #tpu.pipeline_mode<synchronous>, transform_indices = @transform_5, window_bounds = array<i64: 56, 128>}, {pipeline_mode = #tpu.pipeline_mode<synchronous>, transform_indices = @transform_6, window_bounds = array<i64: 2, 32, 128>}, {pipeline_mode = #tpu.pipeline_mode<synchronous>, transform_indices = @transform_7, window_bounds = array<i64: 2, 96, 64>}, {pipeline_mode = #tpu.pipeline_mode<synchronous>, transform_indices = @transform_8, window_bounds = array<i64: 2, 192, 32>}, {transform_indices = @transform_9, window_bounds = array<i64: 1, 16, 128>}]} {
    %c0 = arith.constant 0 : index
    %c0_0 = arith.constant 0 : index
    %c0_1 = arith.constant 0 : index
    %0 = vector.load %arg1[%c0, %c0_0, %c0_1] : memref<1x16x32xf32, #tpu.memory_space<vmem>>, vector<1x16x32xf32>
    %1 = vector.shape_cast %0 : vector<1x16x32xf32> to vector<16x32xf32>
    %c0_2 = arith.constant 0 : index
    %c0_3 = arith.constant 0 : index
    %c0_4 = arith.constant 0 : index
    %2 = vector.load %arg2[%c0_2, %c0_3, %c0_4] : memref<1x16x1xf32, #tpu.memory_space<vmem>>, vector<1x16x1xf32>
    %3 = vector.shape_cast %2 : vector<1x16x1xf32> to vector<16x1xf32>
    %c0_5 = arith.constant 0 : index
    %c0_6 = arith.constant 0 : index
    %c0_7 = arith.constant 0 : index
    %4 = vector.load %arg3[%c0_5, %c0_6, %c0_7] : memref<1x16x1xf32, #tpu.memory_space<vmem>>, vector<1x16x1xf32>
    %5 = vector.shape_cast %4 : vector<1x16x1xf32> to vector<16x1xf32>
    %c0_8 = arith.constant 0 : index
    %c0_9 = arith.constant 0 : index
    %c0_10 = arith.constant 0 : index
    %6 = vector.load %arg4[%c0_8, %c0_9, %c0_10] : memref<1x1x16xf32, #tpu.memory_space<vmem>>, vector<1x1x16xf32>
    %7 = vector.shape_cast %6 : vector<1x1x16xf32> to vector<1x16xf32>
    %c0_11 = arith.constant 0 : index
    %c0_12 = arith.constant 0 : index
    %8 = vector.load %arg6[%c0_11, %c0_12] : memref<56x128xf32, #tpu.memory_space<vmem>>, vector<56x128xf32>
    %9 = tpu.iota {dimensions = array<i32: 0>} : vector<16x1xi32>
    %c1_i32 = arith.constant 1 : i32
    %10 = vector.broadcast %c1_i32 : i32 to vector<16x1xi32>
    %11 = arith.cmpi sge, %9, %10 : vector<16x1xi32>
    %c2_i32 = arith.constant 2 : i32
    %12 = vector.broadcast %c2_i32 : i32 to vector<16x1xi32>
    %13 = arith.cmpi sge, %9, %12 : vector<16x1xi32>
    %c15_i32 = arith.constant 15 : i32
    %14 = vector.broadcast %c15_i32 : i32 to vector<16x1xi32>
    %15 = arith.cmpi slt, %9, %14 : vector<16x1xi32>
    %16 = tpu.iota {dimensions = array<i32: 0>} : vector<16x16xi32>
    %17 = tpu.iota {dimensions = array<i32: 1>} : vector<16x16xi32>
    %18 = arith.cmpi sle, %17, %16 : vector<16x16xi32>
    %19 = arith.truncf %7 : vector<1x16xf32> to vector<1x16xbf16>
    %c0_13 = arith.constant 0 : index
    %c0_14 = arith.constant 0 : index
    %20 = vector.load %arg5[%c0_13, %c0_14] : memref<112x32xbf16, #tpu.memory_space<vmem>>, vector<16x32xbf16>
    %cst = arith.constant dense<0.000000e+00> : vector<1x32xf32>
    %21 = tpu.matmul %19, %20, %cst {dimension_numbers = #tpu.dot_dimension_numbers<[1], [0], [0], [1], [0, 0, 1, 1], [], []>} : vector<1x16xbf16>, vector<16x32xbf16>, vector<1x32xf32> -> vector<1x32xf32>
    %22 = vector.extract_strided_slice %8 {offsets = [0, 0], sizes = [1, 32], strides = [1, 1]} : vector<56x128xf32> to vector<1x32xf32>
    %23 = arith.addf %21, %22 : vector<1x32xf32>
    %24 = vector.broadcast %23 : vector<1x32xf32> to vector<16x32xf32>
    %25 = arith.addf %1, %24 : vector<16x32xf32>
    %26 = vector.extract_strided_slice %8 {offsets = [4, 0], sizes = [1, 32], strides = [1, 1]} : vector<56x128xf32> to vector<1x32xf32>
    %27 = vector.broadcast %3 : vector<16x1xf32> to vector<16x32xf32>
    %28 = vector.broadcast %26 : vector<1x32xf32> to vector<16x32xf32>
    %29 = arith.mulf %27, %28 : vector<16x32xf32>
    %c1_i32_15 = arith.constant 1 : i32
    %30 = tpu.dynamic_rotate %29 by %c1_i32_15 dim 0 : vector<16x32xf32>, i32 -> vector<16x32xf32>
    %cst_16 = arith.constant 0.000000e+00 : f32
    %31 = vector.shape_cast %11 : vector<16x1xi1> to vector<16x1xi1>
    %32 = vector.broadcast %31 : vector<16x1xi1> to vector<16x32xi1>
    %33 = vector.broadcast %cst_16 : f32 to vector<16x32xf32>
    %34 = arith.select %32, %30, %33 : vector<16x32xi1>, vector<16x32xf32>
    %35 = vector.extract_strided_slice %8 {offsets = [5, 0], sizes = [1, 32], strides = [1, 1]} : vector<56x128xf32> to vector<1x32xf32>
    %36 = vector.broadcast %3 : vector<16x1xf32> to vector<16x32xf32>
    %37 = vector.broadcast %35 : vector<1x32xf32> to vector<16x32xf32>
    %38 = arith.mulf %36, %37 : vector<16x32xf32>
    %39 = arith.addf %34, %38 : vector<16x32xf32>
    %40 = vector.extract_strided_slice %8 {offsets = [6, 0], sizes = [1, 32], strides = [1, 1]} : vector<56x128xf32> to vector<1x32xf32>
    %41 = vector.broadcast %3 : vector<16x1xf32> to vector<16x32xf32>
    %42 = vector.broadcast %40 : vector<1x32xf32> to vector<16x32xf32>
    %43 = arith.mulf %41, %42 : vector<16x32xf32>
    %c15_i32_17 = arith.constant 15 : i32
    %44 = tpu.dynamic_rotate %43 by %c15_i32_17 dim 0 : vector<16x32xf32>, i32 -> vector<16x32xf32>
    %cst_18 = arith.constant 0.000000e+00 : f32
    %45 = vector.shape_cast %15 : vector<16x1xi1> to vector<16x1xi1>
    %46 = vector.broadcast %45 : vector<16x1xi1> to vector<16x32xi1>
    %47 = vector.broadcast %cst_18 : f32 to vector<16x32xf32>
    %48 = arith.select %46, %44, %47 : vector<16x32xi1>, vector<16x32xf32>
    %49 = arith.addf %39, %48 : vector<16x32xf32>
    %50 = vector.extract_strided_slice %8 {offsets = [1, 0], sizes = [1, 32], strides = [1, 1]} : vector<56x128xf32> to vector<1x32xf32>
    %51 = vector.broadcast %50 : vector<1x32xf32> to vector<16x32xf32>
    %52 = arith.addf %49, %51 : vector<16x32xf32>
    %53 = arith.addf %25, %52 : vector<16x32xf32>
    %c1_i32_19 = arith.constant 1 : i32
    %54 = tpu.dynamic_rotate %53 by %c1_i32_19 dim 0 : vector<16x32xf32>, i32 -> vector<16x32xf32>
    %cst_20 = arith.constant 0.000000e+00 : f32
    %55 = vector.shape_cast %11 : vector<16x1xi1> to vector<16x1xi1>
    %56 = vector.broadcast %55 : vector<16x1xi1> to vector<16x32xi1>
    %57 = vector.broadcast %cst_20 : f32 to vector<16x32xf32>
    %58 = arith.select %56, %54, %57 : vector<16x32xi1>, vector<16x32xf32>
    %c15_i32_21 = arith.constant 15 : i32
    %59 = tpu.dynamic_rotate %53 by %c15_i32_21 dim 0 : vector<16x32xf32>, i32 -> vector<16x32xf32>
    %cst_22 = arith.constant 0.000000e+00 : f32
    %60 = vector.shape_cast %15 : vector<16x1xi1> to vector<16x1xi1>
    %61 = vector.broadcast %60 : vector<16x1xi1> to vector<16x32xi1>
    %62 = vector.broadcast %cst_22 : f32 to vector<16x32xf32>
    %63 = arith.select %61, %59, %62 : vector<16x32xi1>, vector<16x32xf32>
    %64 = vector.extract_strided_slice %8 {offsets = [2, 0], sizes = [1, 32], strides = [1, 1]} : vector<56x128xf32> to vector<1x32xf32>
    %c16 = arith.constant 16 : index
    %c0_23 = arith.constant 0 : index
    %65 = vector.load %arg5[%c16, %c0_23] : memref<112x32xbf16, #tpu.memory_space<vmem>>, vector<32x32xbf16>
    %66 = arith.truncf %58 : vector<16x32xf32> to vector<16x32xbf16>
    %cst_24 = arith.constant dense<0.000000e+00> : vector<16x32xf32>
    %67 = tpu.matmul %66, %65, %cst_24 {dimension_numbers = #tpu.dot_dimension_numbers<[1], [0], [0], [1], [0, 0, 1, 1], [], []>} : vector<16x32xbf16>, vector<32x32xbf16>, vector<16x32xf32> -> vector<16x32xf32>
    %68 = vector.broadcast %64 : vector<1x32xf32> to vector<16x32xf32>
    %69 = arith.addf %68, %67 : vector<16x32xf32>
    %c48 = arith.constant 48 : index
    %c0_25 = arith.constant 0 : index
    %70 = vector.load %arg5[%c48, %c0_25] : memref<112x32xbf16, #tpu.memory_space<vmem>>, vector<32x32xbf16>
    %71 = arith.truncf %53 : vector<16x32xf32> to vector<16x32xbf16>
    %cst_26 = arith.constant dense<0.000000e+00> : vector<16x32xf32>
    %72 = tpu.matmul %71, %70, %cst_26 {dimension_numbers = #tpu.dot_dimension_numbers<[1], [0], [0], [1], [0, 0, 1, 1], [], []>} : vector<16x32xbf16>, vector<32x32xbf16>, vector<16x32xf32> -> vector<16x32xf32>
    %73 = arith.addf %69, %72 : vector<16x32xf32>
    %c80 = arith.constant 80 : index
    %c0_27 = arith.constant 0 : index
    %74 = vector.load %arg5[%c80, %c0_27] : memref<112x32xbf16, #tpu.memory_space<vmem>>, vector<32x32xbf16>
    %75 = arith.truncf %63 : vector<16x32xf32> to vector<16x32xbf16>
    %cst_28 = arith.constant dense<0.000000e+00> : vector<16x32xf32>
    %76 = tpu.matmul %75, %74, %cst_28 {dimension_numbers = #tpu.dot_dimension_numbers<[1], [0], [0], [1], [0, 0, 1, 1], [], []>} : vector<16x32xbf16>, vector<32x32xbf16>, vector<16x32xf32> -> vector<16x32xf32>
    %77 = arith.addf %73, %76 : vector<16x32xf32>
    %78 = vector.broadcast %5 : vector<16x1xf32> to vector<16x32xf32>
    %79 = arith.mulf %77, %78 : vector<16x32xf32>
    %80 = vector.broadcast %5 : vector<16x1xf32> to vector<16x32xf32>
    %81 = arith.mulf %79, %80 : vector<16x32xf32>
    %c0_29 = arith.constant 0 : index
    %c0_30 = arith.constant 0 : index
    %c0_31 = arith.constant 0 : index
    %82 = vector.load %arg7[%c0_29, %c0_30, %c0_31] : memref<2x32x128xbf16, #tpu.memory_space<vmem>>, vector<1x32x128xbf16>
    %83 = vector.shape_cast %82 : vector<1x32x128xbf16> to vector<32x128xbf16>
    %84 = arith.truncf %81 : vector<16x32xf32> to vector<16x32xbf16>
    %cst_32 = arith.constant dense<0.000000e+00> : vector<16x128xf32>
    %85 = tpu.matmul %84, %83, %cst_32 {dimension_numbers = #tpu.dot_dimension_numbers<[1], [0], [0], [1], [0, 0, 1, 1], [], []>} : vector<16x32xbf16>, vector<32x128xbf16>, vector<16x128xf32> -> vector<16x128xf32>
    %86 = vector.extract_strided_slice %8 {offsets = [8, 0], sizes = [1, 128], strides = [1, 1]} : vector<56x128xf32> to vector<1x128xf32>
    %87 = vector.broadcast %86 : vector<1x128xf32> to vector<16x128xf32>
    %88 = arith.addf %85, %87 : vector<16x128xf32>
    %cst_33 = arith.constant 0.000000e+00 : f32
    %89 = vector.broadcast %cst_33 : f32 to vector<16x32xf32>
    %90 = vector.extract_strided_slice %88 {offsets = [0, 0], sizes = [16, 16], strides = [1, 1]} : vector<16x128xf32> to vector<16x16xf32>
    %91 = vector.extract_strided_slice %88 {offsets = [0, 32], sizes = [16, 16], strides = [1, 1]} : vector<16x128xf32> to vector<16x16xf32>
    %92 = vector.extract_strided_slice %88 {offsets = [0, 64], sizes = [16, 32], strides = [1, 1]} : vector<16x128xf32> to vector<16x32xf32>
    %93 = arith.truncf %90 : vector<16x16xf32> to vector<16x16xbf16>
    %94 = arith.truncf %91 : vector<16x16xf32> to vector<16x16xbf16>
    %cst_34 = arith.constant dense<0.000000e+00> : vector<16x16xf32>
    %95 = tpu.matmul %93, %94, %cst_34 {dimension_numbers = #tpu.dot_dimension_numbers<[1], [1], [0], [0], [0, 0, 1, 0], [], []>} : vector<16x16xbf16>, vector<16x16xbf16>, vector<16x16xf32> -> vector<16x16xf32>
    %cst_35 = arith.constant -1.000000e+04 : f32
    %96 = vector.broadcast %cst_35 : f32 to vector<16x16xf32>
    %97 = arith.select %18, %95, %96 : vector<16x16xi1>, vector<16x16xf32>
    %cst_36 = arith.constant dense<0xFF800000> : vector<16xf32>
    %98 = vector.multi_reduction <maximumf>, %97, %cst_36 [1] : vector<16x16xf32> to vector<16xf32>
    %99 = vector.shape_cast %98 : vector<16xf32> to vector<16x1xf32>
    %100 = vector.broadcast %99 : vector<16x1xf32> to vector<16x16xf32>
    %101 = arith.subf %97, %100 : vector<16x16xf32>
    %102 = math.exp %101 : vector<16x16xf32>
    %cst_37 = arith.constant dense<0.000000e+00> : vector<16xf32>
    %103 = vector.multi_reduction <add>, %102, %cst_37 [1] : vector<16x16xf32> to vector<16xf32>
    %104 = vector.shape_cast %103 : vector<16xf32> to vector<16x1xf32>
    %105 = tpu.reciprocal %104 {approx = true} : vector<16x1xf32> -> vector<16x1xf32>
    %106 = vector.broadcast %105 : vector<16x1xf32> to vector<16x16xf32>
    %107 = arith.mulf %102, %106 : vector<16x16xf32>
    %108 = arith.truncf %107 : vector<16x16xf32> to vector<16x16xbf16>
    %109 = arith.truncf %92 : vector<16x32xf32> to vector<16x32xbf16>
    %cst_38 = arith.constant dense<0.000000e+00> : vector<16x32xf32>
    %110 = tpu.matmul %108, %109, %cst_38 {dimension_numbers = #tpu.dot_dimension_numbers<[1], [0], [0], [1], [0, 0, 1, 1], [], []>} : vector<16x16xbf16>, vector<16x32xbf16>, vector<16x32xf32> -> vector<16x32xf32>
    %111 = arith.addf %89, %110 : vector<16x32xf32>
    %112 = vector.extract_strided_slice %88 {offsets = [0, 16], sizes = [16, 16], strides = [1, 1]} : vector<16x128xf32> to vector<16x16xf32>
    %113 = vector.extract_strided_slice %88 {offsets = [0, 48], sizes = [16, 16], strides = [1, 1]} : vector<16x128xf32> to vector<16x16xf32>
    %114 = vector.extract_strided_slice %88 {offsets = [0, 96], sizes = [16, 32], strides = [1, 1]} : vector<16x128xf32> to vector<16x32xf32>
    %115 = arith.truncf %112 : vector<16x16xf32> to vector<16x16xbf16>
    %116 = arith.truncf %113 : vector<16x16xf32> to vector<16x16xbf16>
    %cst_39 = arith.constant dense<0.000000e+00> : vector<16x16xf32>
    %117 = tpu.matmul %115, %116, %cst_39 {dimension_numbers = #tpu.dot_dimension_numbers<[1], [1], [0], [0], [0, 0, 1, 0], [], []>} : vector<16x16xbf16>, vector<16x16xbf16>, vector<16x16xf32> -> vector<16x16xf32>
    %cst_40 = arith.constant -1.000000e+04 : f32
    %118 = vector.broadcast %cst_40 : f32 to vector<16x16xf32>
    %119 = arith.select %18, %117, %118 : vector<16x16xi1>, vector<16x16xf32>
    %cst_41 = arith.constant dense<0xFF800000> : vector<16xf32>
    %120 = vector.multi_reduction <maximumf>, %119, %cst_41 [1] : vector<16x16xf32> to vector<16xf32>
    %121 = vector.shape_cast %120 : vector<16xf32> to vector<16x1xf32>
    %122 = vector.broadcast %121 : vector<16x1xf32> to vector<16x16xf32>
    %123 = arith.subf %119, %122 : vector<16x16xf32>
    %124 = math.exp %123 : vector<16x16xf32>
    %cst_42 = arith.constant dense<0.000000e+00> : vector<16xf32>
    %125 = vector.multi_reduction <add>, %124, %cst_42 [1] : vector<16x16xf32> to vector<16xf32>
    %126 = vector.shape_cast %125 : vector<16xf32> to vector<16x1xf32>
    %127 = tpu.reciprocal %126 {approx = true} : vector<16x1xf32> -> vector<16x1xf32>
    %128 = vector.broadcast %127 : vector<16x1xf32> to vector<16x16xf32>
    %129 = arith.mulf %124, %128 : vector<16x16xf32>
    %130 = arith.truncf %129 : vector<16x16xf32> to vector<16x16xbf16>
    %131 = arith.truncf %114 : vector<16x32xf32> to vector<16x32xbf16>
    %cst_43 = arith.constant dense<0.000000e+00> : vector<16x32xf32>
    %132 = tpu.matmul %130, %131, %cst_43 {dimension_numbers = #tpu.dot_dimension_numbers<[1], [0], [0], [1], [0, 0, 1, 1], [], []>} : vector<16x16xbf16>, vector<16x32xbf16>, vector<16x32xf32> -> vector<16x32xf32>
    %133 = arith.addf %111, %132 : vector<16x32xf32>
    %134 = vector.extract_strided_slice %8 {offsets = [9, 0], sizes = [1, 32], strides = [1, 1]} : vector<56x128xf32> to vector<1x32xf32>
    %135 = vector.broadcast %134 : vector<1x32xf32> to vector<16x32xf32>
    %136 = arith.addf %133, %135 : vector<16x32xf32>
    %137 = arith.addf %81, %136 : vector<16x32xf32>
    %138 = vector.extract_strided_slice %8 {offsets = [10, 0], sizes = [1, 32], strides = [1, 1]} : vector<56x128xf32> to vector<1x32xf32>
    %139 = vector.extract_strided_slice %8 {offsets = [11, 0], sizes = [1, 32], strides = [1, 1]} : vector<56x128xf32> to vector<1x32xf32>
    %cst_44 = arith.constant dense<0.000000e+00> : vector<16xf32>
    %140 = vector.multi_reduction <add>, %137, %cst_44 [1] : vector<16x32xf32> to vector<16xf32>
    %141 = vector.shape_cast %140 : vector<16xf32> to vector<16x1xf32>
    %cst_45 = arith.constant 3.200000e+01 : f32
    %142 = vector.broadcast %cst_45 : f32 to vector<16x1xf32>
    %143 = arith.divf %141, %142 : vector<16x1xf32>
    %144 = vector.broadcast %143 : vector<16x1xf32> to vector<16x32xf32>
    %145 = arith.subf %137, %144 : vector<16x32xf32>
    %146 = arith.mulf %145, %145 : vector<16x32xf32>
    %cst_46 = arith.constant dense<0.000000e+00> : vector<16xf32>
    %147 = vector.multi_reduction <add>, %146, %cst_46 [1] : vector<16x32xf32> to vector<16xf32>
    %148 = vector.shape_cast %147 : vector<16xf32> to vector<16x1xf32>
    %cst_47 = arith.constant 3.200000e+01 : f32
    %149 = vector.broadcast %cst_47 : f32 to vector<16x1xf32>
    %150 = arith.divf %148, %149 : vector<16x1xf32>
    %151 = vector.broadcast %143 : vector<16x1xf32> to vector<16x32xf32>
    %152 = arith.subf %137, %151 : vector<16x32xf32>
    %cst_48 = arith.constant 9.99999974E-6 : f32
    %153 = vector.broadcast %cst_48 : f32 to vector<16x1xf32>
    %154 = arith.addf %150, %153 : vector<16x1xf32>
    %155 = math.rsqrt %154 : vector<16x1xf32>
    %156 = vector.broadcast %155 : vector<16x1xf32> to vector<16x32xf32>
    %157 = arith.mulf %152, %156 : vector<16x32xf32>
    %158 = vector.broadcast %138 : vector<1x32xf32> to vector<16x32xf32>
    %159 = arith.mulf %157, %158 : vector<16x32xf32>
    %160 = vector.broadcast %139 : vector<1x32xf32> to vector<16x32xf32>
    %161 = arith.addf %159, %160 : vector<16x32xf32>
    %162 = vector.broadcast %5 : vector<16x1xf32> to vector<16x32xf32>
    %163 = arith.mulf %161, %162 : vector<16x32xf32>
    %c0_49 = arith.constant 0 : index
    %c0_50 = arith.constant 0 : index
    %c0_51 = arith.constant 0 : index
    %164 = vector.load %arg8[%c0_49, %c0_50, %c0_51] : memref<2x96x64xbf16, #tpu.memory_space<vmem>>, vector<1x96x64xbf16>
    %165 = vector.shape_cast %164 : vector<1x96x64xbf16> to vector<96x64xbf16>
    %c0_52 = arith.constant 0 : index
    %c0_53 = arith.constant 0 : index
    %c0_54 = arith.constant 0 : index
    %166 = vector.load %arg9[%c0_52, %c0_53, %c0_54] : memref<2x192x32xbf16, #tpu.memory_space<vmem>>, vector<1x192x32xbf16>
    %167 = vector.shape_cast %166 : vector<1x192x32xbf16> to vector<192x32xbf16>
    %c2_i32_55 = arith.constant 2 : i32
    %168 = tpu.dynamic_rotate %163 by %c2_i32_55 dim 0 : vector<16x32xf32>, i32 -> vector<16x32xf32>
    %cst_56 = arith.constant 0.000000e+00 : f32
    %169 = vector.shape_cast %13 : vector<16x1xi1> to vector<16x1xi1>
    %170 = vector.broadcast %169 : vector<16x1xi1> to vector<16x32xi1>
    %171 = vector.broadcast %cst_56 : f32 to vector<16x32xf32>
    %172 = arith.select %170, %168, %171 : vector<16x32xi1>, vector<16x32xf32>
    %c1_i32_57 = arith.constant 1 : i32
    %173 = tpu.dynamic_rotate %163 by %c1_i32_57 dim 0 : vector<16x32xf32>, i32 -> vector<16x32xf32>
    %cst_58 = arith.constant 0.000000e+00 : f32
    %174 = vector.shape_cast %11 : vector<16x1xi1> to vector<16x1xi1>
    %175 = vector.broadcast %174 : vector<16x1xi1> to vector<16x32xi1>
    %176 = vector.broadcast %cst_58 : f32 to vector<16x32xf32>
    %177 = arith.select %175, %173, %176 : vector<16x32xi1>, vector<16x32xf32>
    %178 = vector.extract_strided_slice %8 {offsets = [12, 0], sizes = [1, 64], strides = [1, 1]} : vector<56x128xf32> to vector<1x64xf32>
    %179 = arith.truncf %172 : vector<16x32xf32> to vector<16x32xbf16>
    %180 = vector.extract_strided_slice %165 {offsets = [0, 0], sizes = [32, 64], strides = [1, 1]} : vector<96x64xbf16> to vector<32x64xbf16>
    %cst_59 = arith.constant dense<0.000000e+00> : vector<16x64xf32>
    %181 = tpu.matmul %179, %180, %cst_59 {dimension_numbers = #tpu.dot_dimension_numbers<[1], [0], [0], [1], [0, 0, 1, 1], [], []>} : vector<16x32xbf16>, vector<32x64xbf16>, vector<16x64xf32> -> vector<16x64xf32>
    %182 = vector.broadcast %178 : vector<1x64xf32> to vector<16x64xf32>
    %183 = arith.addf %182, %181 : vector<16x64xf32>
    %184 = arith.truncf %177 : vector<16x32xf32> to vector<16x32xbf16>
    %185 = vector.extract_strided_slice %165 {offsets = [32, 0], sizes = [32, 64], strides = [1, 1]} : vector<96x64xbf16> to vector<32x64xbf16>
    %cst_60 = arith.constant dense<0.000000e+00> : vector<16x64xf32>
    %186 = tpu.matmul %184, %185, %cst_60 {dimension_numbers = #tpu.dot_dimension_numbers<[1], [0], [0], [1], [0, 0, 1, 1], [], []>} : vector<16x32xbf16>, vector<32x64xbf16>, vector<16x64xf32> -> vector<16x64xf32>
    %187 = arith.addf %183, %186 : vector<16x64xf32>
    %188 = arith.truncf %163 : vector<16x32xf32> to vector<16x32xbf16>
    %189 = vector.extract_strided_slice %165 {offsets = [64, 0], sizes = [32, 64], strides = [1, 1]} : vector<96x64xbf16> to vector<32x64xbf16>
    %cst_61 = arith.constant dense<0.000000e+00> : vector<16x64xf32>
    %190 = tpu.matmul %188, %189, %cst_61 {dimension_numbers = #tpu.dot_dimension_numbers<[1], [0], [0], [1], [0, 0, 1, 1], [], []>} : vector<16x32xbf16>, vector<32x64xbf16>, vector<16x64xf32> -> vector<16x64xf32>
    %191 = arith.addf %187, %190 : vector<16x64xf32>
    %cst_62 = arith.constant 0.000000e+00 : f32
    %192 = vector.broadcast %cst_62 : f32 to vector<16x64xf32>
    %193 = arith.maximumf %191, %192 : vector<16x64xf32>
    %194 = vector.broadcast %5 : vector<16x1xf32> to vector<16x64xf32>
    %195 = arith.mulf %193, %194 : vector<16x64xf32>
    %c2_i32_63 = arith.constant 2 : i32
    %196 = tpu.dynamic_rotate %195 by %c2_i32_63 dim 0 : vector<16x64xf32>, i32 -> vector<16x64xf32>
    %cst_64 = arith.constant 0.000000e+00 : f32
    %197 = vector.shape_cast %13 : vector<16x1xi1> to vector<16x1xi1>
    %198 = vector.broadcast %197 : vector<16x1xi1> to vector<16x64xi1>
    %199 = vector.broadcast %cst_64 : f32 to vector<16x64xf32>
    %200 = arith.select %198, %196, %199 : vector<16x64xi1>, vector<16x64xf32>
    %c1_i32_65 = arith.constant 1 : i32
    %201 = tpu.dynamic_rotate %195 by %c1_i32_65 dim 0 : vector<16x64xf32>, i32 -> vector<16x64xf32>
    %cst_66 = arith.constant 0.000000e+00 : f32
    %202 = vector.shape_cast %11 : vector<16x1xi1> to vector<16x1xi1>
    %203 = vector.broadcast %202 : vector<16x1xi1> to vector<16x64xi1>
    %204 = vector.broadcast %cst_66 : f32 to vector<16x64xf32>
    %205 = arith.select %203, %201, %204 : vector<16x64xi1>, vector<16x64xf32>
    %206 = vector.extract_strided_slice %8 {offsets = [13, 0], sizes = [1, 32], strides = [1, 1]} : vector<56x128xf32> to vector<1x32xf32>
    %207 = arith.truncf %200 : vector<16x64xf32> to vector<16x64xbf16>
    %208 = vector.extract_strided_slice %167 {offsets = [0, 0], sizes = [64, 32], strides = [1, 1]} : vector<192x32xbf16> to vector<64x32xbf16>
    %cst_67 = arith.constant dense<0.000000e+00> : vector<16x32xf32>
    %209 = tpu.matmul %207, %208, %cst_67 {dimension_numbers = #tpu.dot_dimension_numbers<[1], [0], [0], [1], [0, 0, 1, 1], [], []>} : vector<16x64xbf16>, vector<64x32xbf16>, vector<16x32xf32> -> vector<16x32xf32>
    %210 = vector.broadcast %206 : vector<1x32xf32> to vector<16x32xf32>
    %211 = arith.addf %210, %209 : vector<16x32xf32>
    %212 = arith.truncf %205 : vector<16x64xf32> to vector<16x64xbf16>
    %213 = vector.extract_strided_slice %167 {offsets = [64, 0], sizes = [64, 32], strides = [1, 1]} : vector<192x32xbf16> to vector<64x32xbf16>
    %cst_68 = arith.constant dense<0.000000e+00> : vector<16x32xf32>
    %214 = tpu.matmul %212, %213, %cst_68 {dimension_numbers = #tpu.dot_dimension_numbers<[1], [0], [0], [1], [0, 0, 1, 1], [], []>} : vector<16x64xbf16>, vector<64x32xbf16>, vector<16x32xf32> -> vector<16x32xf32>
    %215 = arith.addf %211, %214 : vector<16x32xf32>
    %216 = arith.truncf %195 : vector<16x64xf32> to vector<16x64xbf16>
    %217 = vector.extract_strided_slice %167 {offsets = [128, 0], sizes = [64, 32], strides = [1, 1]} : vector<192x32xbf16> to vector<64x32xbf16>
    %cst_69 = arith.constant dense<0.000000e+00> : vector<16x32xf32>
    %218 = tpu.matmul %216, %217, %cst_69 {dimension_numbers = #tpu.dot_dimension_numbers<[1], [0], [0], [1], [0, 0, 1, 1], [], []>} : vector<16x64xbf16>, vector<64x32xbf16>, vector<16x32xf32> -> vector<16x32xf32>
    %219 = arith.addf %215, %218 : vector<16x32xf32>
    %220 = vector.broadcast %5 : vector<16x1xf32> to vector<16x32xf32>
    %221 = arith.mulf %219, %220 : vector<16x32xf32>
    %222 = arith.addf %161, %221 : vector<16x32xf32>
    %223 = vector.extract_strided_slice %8 {offsets = [14, 0], sizes = [1, 32], strides = [1, 1]} : vector<56x128xf32> to vector<1x32xf32>
    %224 = vector.extract_strided_slice %8 {offsets = [15, 0], sizes = [1, 32], strides = [1, 1]} : vector<56x128xf32> to vector<1x32xf32>
    %cst_70 = arith.constant dense<0.000000e+00> : vector<16xf32>
    %225 = vector.multi_reduction <add>, %222, %cst_70 [1] : vector<16x32xf32> to vector<16xf32>
    %226 = vector.shape_cast %225 : vector<16xf32> to vector<16x1xf32>
    %cst_71 = arith.constant 3.200000e+01 : f32
    %227 = vector.broadcast %cst_71 : f32 to vector<16x1xf32>
    %228 = arith.divf %226, %227 : vector<16x1xf32>
    %229 = vector.broadcast %228 : vector<16x1xf32> to vector<16x32xf32>
    %230 = arith.subf %222, %229 : vector<16x32xf32>
    %231 = arith.mulf %230, %230 : vector<16x32xf32>
    %cst_72 = arith.constant dense<0.000000e+00> : vector<16xf32>
    %232 = vector.multi_reduction <add>, %231, %cst_72 [1] : vector<16x32xf32> to vector<16xf32>
    %233 = vector.shape_cast %232 : vector<16xf32> to vector<16x1xf32>
    %cst_73 = arith.constant 3.200000e+01 : f32
    %234 = vector.broadcast %cst_73 : f32 to vector<16x1xf32>
    %235 = arith.divf %233, %234 : vector<16x1xf32>
    %236 = vector.broadcast %228 : vector<16x1xf32> to vector<16x32xf32>
    %237 = arith.subf %222, %236 : vector<16x32xf32>
    %cst_74 = arith.constant 9.99999974E-6 : f32
    %238 = vector.broadcast %cst_74 : f32 to vector<16x1xf32>
    %239 = arith.addf %235, %238 : vector<16x1xf32>
    %240 = math.rsqrt %239 : vector<16x1xf32>
    %241 = vector.broadcast %240 : vector<16x1xf32> to vector<16x32xf32>
    %242 = arith.mulf %237, %241 : vector<16x32xf32>
    %243 = vector.broadcast %223 : vector<1x32xf32> to vector<16x32xf32>
    %244 = arith.mulf %242, %243 : vector<16x32xf32>
    %245 = vector.broadcast %224 : vector<1x32xf32> to vector<16x32xf32>
    %246 = arith.addf %244, %245 : vector<16x32xf32>
    %c1 = arith.constant 1 : index
    %c0_75 = arith.constant 0 : index
    %c0_76 = arith.constant 0 : index
    %247 = vector.load %arg7[%c1, %c0_75, %c0_76] : memref<2x32x128xbf16, #tpu.memory_space<vmem>>, vector<1x32x128xbf16>
    %248 = vector.shape_cast %247 : vector<1x32x128xbf16> to vector<32x128xbf16>
    %249 = arith.truncf %246 : vector<16x32xf32> to vector<16x32xbf16>
    %cst_77 = arith.constant dense<0.000000e+00> : vector<16x128xf32>
    %250 = tpu.matmul %249, %248, %cst_77 {dimension_numbers = #tpu.dot_dimension_numbers<[1], [0], [0], [1], [0, 0, 1, 1], [], []>} : vector<16x32xbf16>, vector<32x128xbf16>, vector<16x128xf32> -> vector<16x128xf32>
    %251 = vector.extract_strided_slice %8 {offsets = [16, 0], sizes = [1, 128], strides = [1, 1]} : vector<56x128xf32> to vector<1x128xf32>
    %252 = vector.broadcast %251 : vector<1x128xf32> to vector<16x128xf32>
    %253 = arith.addf %250, %252 : vector<16x128xf32>
    %cst_78 = arith.constant 0.000000e+00 : f32
    %254 = vector.broadcast %cst_78 : f32 to vector<16x32xf32>
    %255 = vector.extract_strided_slice %253 {offsets = [0, 0], sizes = [16, 16], strides = [1, 1]} : vector<16x128xf32> to vector<16x16xf32>
    %256 = vector.extract_strided_slice %253 {offsets = [0, 32], sizes = [16, 16], strides = [1, 1]} : vector<16x128xf32> to vector<16x16xf32>
    %257 = vector.extract_strided_slice %253 {offsets = [0, 64], sizes = [16, 32], strides = [1, 1]} : vector<16x128xf32> to vector<16x32xf32>
    %258 = arith.truncf %255 : vector<16x16xf32> to vector<16x16xbf16>
    %259 = arith.truncf %256 : vector<16x16xf32> to vector<16x16xbf16>
    %cst_79 = arith.constant dense<0.000000e+00> : vector<16x16xf32>
    %260 = tpu.matmul %258, %259, %cst_79 {dimension_numbers = #tpu.dot_dimension_numbers<[1], [1], [0], [0], [0, 0, 1, 0], [], []>} : vector<16x16xbf16>, vector<16x16xbf16>, vector<16x16xf32> -> vector<16x16xf32>
    %cst_80 = arith.constant -1.000000e+04 : f32
    %261 = vector.broadcast %cst_80 : f32 to vector<16x16xf32>
    %262 = arith.select %18, %260, %261 : vector<16x16xi1>, vector<16x16xf32>
    %cst_81 = arith.constant dense<0xFF800000> : vector<16xf32>
    %263 = vector.multi_reduction <maximumf>, %262, %cst_81 [1] : vector<16x16xf32> to vector<16xf32>
    %264 = vector.shape_cast %263 : vector<16xf32> to vector<16x1xf32>
    %265 = vector.broadcast %264 : vector<16x1xf32> to vector<16x16xf32>
    %266 = arith.subf %262, %265 : vector<16x16xf32>
    %267 = math.exp %266 : vector<16x16xf32>
    %cst_82 = arith.constant dense<0.000000e+00> : vector<16xf32>
    %268 = vector.multi_reduction <add>, %267, %cst_82 [1] : vector<16x16xf32> to vector<16xf32>
    %269 = vector.shape_cast %268 : vector<16xf32> to vector<16x1xf32>
    %270 = tpu.reciprocal %269 {approx = true} : vector<16x1xf32> -> vector<16x1xf32>
    %271 = vector.broadcast %270 : vector<16x1xf32> to vector<16x16xf32>
    %272 = arith.mulf %267, %271 : vector<16x16xf32>
    %273 = arith.truncf %272 : vector<16x16xf32> to vector<16x16xbf16>
    %274 = arith.truncf %257 : vector<16x32xf32> to vector<16x32xbf16>
    %cst_83 = arith.constant dense<0.000000e+00> : vector<16x32xf32>
    %275 = tpu.matmul %273, %274, %cst_83 {dimension_numbers = #tpu.dot_dimension_numbers<[1], [0], [0], [1], [0, 0, 1, 1], [], []>} : vector<16x16xbf16>, vector<16x32xbf16>, vector<16x32xf32> -> vector<16x32xf32>
    %276 = arith.addf %254, %275 : vector<16x32xf32>
    %277 = vector.extract_strided_slice %253 {offsets = [0, 16], sizes = [16, 16], strides = [1, 1]} : vector<16x128xf32> to vector<16x16xf32>
    %278 = vector.extract_strided_slice %253 {offsets = [0, 48], sizes = [16, 16], strides = [1, 1]} : vector<16x128xf32> to vector<16x16xf32>
    %279 = vector.extract_strided_slice %253 {offsets = [0, 96], sizes = [16, 32], strides = [1, 1]} : vector<16x128xf32> to vector<16x32xf32>
    %280 = arith.truncf %277 : vector<16x16xf32> to vector<16x16xbf16>
    %281 = arith.truncf %278 : vector<16x16xf32> to vector<16x16xbf16>
    %cst_84 = arith.constant dense<0.000000e+00> : vector<16x16xf32>
    %282 = tpu.matmul %280, %281, %cst_84 {dimension_numbers = #tpu.dot_dimension_numbers<[1], [1], [0], [0], [0, 0, 1, 0], [], []>} : vector<16x16xbf16>, vector<16x16xbf16>, vector<16x16xf32> -> vector<16x16xf32>
    %cst_85 = arith.constant -1.000000e+04 : f32
    %283 = vector.broadcast %cst_85 : f32 to vector<16x16xf32>
    %284 = arith.select %18, %282, %283 : vector<16x16xi1>, vector<16x16xf32>
    %cst_86 = arith.constant dense<0xFF800000> : vector<16xf32>
    %285 = vector.multi_reduction <maximumf>, %284, %cst_86 [1] : vector<16x16xf32> to vector<16xf32>
    %286 = vector.shape_cast %285 : vector<16xf32> to vector<16x1xf32>
    %287 = vector.broadcast %286 : vector<16x1xf32> to vector<16x16xf32>
    %288 = arith.subf %284, %287 : vector<16x16xf32>
    %289 = math.exp %288 : vector<16x16xf32>
    %cst_87 = arith.constant dense<0.000000e+00> : vector<16xf32>
    %290 = vector.multi_reduction <add>, %289, %cst_87 [1] : vector<16x16xf32> to vector<16xf32>
    %291 = vector.shape_cast %290 : vector<16xf32> to vector<16x1xf32>
    %292 = tpu.reciprocal %291 {approx = true} : vector<16x1xf32> -> vector<16x1xf32>
    %293 = vector.broadcast %292 : vector<16x1xf32> to vector<16x16xf32>
    %294 = arith.mulf %289, %293 : vector<16x16xf32>
    %295 = arith.truncf %294 : vector<16x16xf32> to vector<16x16xbf16>
    %296 = arith.truncf %279 : vector<16x32xf32> to vector<16x32xbf16>
    %cst_88 = arith.constant dense<0.000000e+00> : vector<16x32xf32>
    %297 = tpu.matmul %295, %296, %cst_88 {dimension_numbers = #tpu.dot_dimension_numbers<[1], [0], [0], [1], [0, 0, 1, 1], [], []>} : vector<16x16xbf16>, vector<16x32xbf16>, vector<16x32xf32> -> vector<16x32xf32>
    %298 = arith.addf %276, %297 : vector<16x32xf32>
    %299 = vector.extract_strided_slice %8 {offsets = [17, 0], sizes = [1, 32], strides = [1, 1]} : vector<56x128xf32> to vector<1x32xf32>
    %300 = vector.broadcast %299 : vector<1x32xf32> to vector<16x32xf32>
    %301 = arith.addf %298, %300 : vector<16x32xf32>
    %302 = arith.addf %246, %301 : vector<16x32xf32>
    %303 = vector.extract_strided_slice %8 {offsets = [18, 0], sizes = [1, 32], strides = [1, 1]} : vector<56x128xf32> to vector<1x32xf32>
    %304 = vector.extract_strided_slice %8 {offsets = [19, 0], sizes = [1, 32], strides = [1, 1]} : vector<56x128xf32> to vector<1x32xf32>
    %cst_89 = arith.constant dense<0.000000e+00> : vector<16xf32>
    %305 = vector.multi_reduction <add>, %302, %cst_89 [1] : vector<16x32xf32> to vector<16xf32>
    %306 = vector.shape_cast %305 : vector<16xf32> to vector<16x1xf32>
    %cst_90 = arith.constant 3.200000e+01 : f32
    %307 = vector.broadcast %cst_90 : f32 to vector<16x1xf32>
    %308 = arith.divf %306, %307 : vector<16x1xf32>
    %309 = vector.broadcast %308 : vector<16x1xf32> to vector<16x32xf32>
    %310 = arith.subf %302, %309 : vector<16x32xf32>
    %311 = arith.mulf %310, %310 : vector<16x32xf32>
    %cst_91 = arith.constant dense<0.000000e+00> : vector<16xf32>
    %312 = vector.multi_reduction <add>, %311, %cst_91 [1] : vector<16x32xf32> to vector<16xf32>
    %313 = vector.shape_cast %312 : vector<16xf32> to vector<16x1xf32>
    %cst_92 = arith.constant 3.200000e+01 : f32
    %314 = vector.broadcast %cst_92 : f32 to vector<16x1xf32>
    %315 = arith.divf %313, %314 : vector<16x1xf32>
    %316 = vector.broadcast %308 : vector<16x1xf32> to vector<16x32xf32>
    %317 = arith.subf %302, %316 : vector<16x32xf32>
    %cst_93 = arith.constant 9.99999974E-6 : f32
    %318 = vector.broadcast %cst_93 : f32 to vector<16x1xf32>
    %319 = arith.addf %315, %318 : vector<16x1xf32>
    %320 = math.rsqrt %319 : vector<16x1xf32>
    %321 = vector.broadcast %320 : vector<16x1xf32> to vector<16x32xf32>
    %322 = arith.mulf %317, %321 : vector<16x32xf32>
    %323 = vector.broadcast %303 : vector<1x32xf32> to vector<16x32xf32>
    %324 = arith.mulf %322, %323 : vector<16x32xf32>
    %325 = vector.broadcast %304 : vector<1x32xf32> to vector<16x32xf32>
    %326 = arith.addf %324, %325 : vector<16x32xf32>
    %327 = vector.broadcast %5 : vector<16x1xf32> to vector<16x32xf32>
    %328 = arith.mulf %326, %327 : vector<16x32xf32>
    %c1_94 = arith.constant 1 : index
    %c0_95 = arith.constant 0 : index
    %c0_96 = arith.constant 0 : index
    %329 = vector.load %arg8[%c1_94, %c0_95, %c0_96] : memref<2x96x64xbf16, #tpu.memory_space<vmem>>, vector<1x96x64xbf16>
    %330 = vector.shape_cast %329 : vector<1x96x64xbf16> to vector<96x64xbf16>
    %c1_97 = arith.constant 1 : index
    %c0_98 = arith.constant 0 : index
    %c0_99 = arith.constant 0 : index
    %331 = vector.load %arg9[%c1_97, %c0_98, %c0_99] : memref<2x192x32xbf16, #tpu.memory_space<vmem>>, vector<1x192x32xbf16>
    %332 = vector.shape_cast %331 : vector<1x192x32xbf16> to vector<192x32xbf16>
    %c2_i32_100 = arith.constant 2 : i32
    %333 = tpu.dynamic_rotate %328 by %c2_i32_100 dim 0 : vector<16x32xf32>, i32 -> vector<16x32xf32>
    %cst_101 = arith.constant 0.000000e+00 : f32
    %334 = vector.shape_cast %13 : vector<16x1xi1> to vector<16x1xi1>
    %335 = vector.broadcast %334 : vector<16x1xi1> to vector<16x32xi1>
    %336 = vector.broadcast %cst_101 : f32 to vector<16x32xf32>
    %337 = arith.select %335, %333, %336 : vector<16x32xi1>, vector<16x32xf32>
    %c1_i32_102 = arith.constant 1 : i32
    %338 = tpu.dynamic_rotate %328 by %c1_i32_102 dim 0 : vector<16x32xf32>, i32 -> vector<16x32xf32>
    %cst_103 = arith.constant 0.000000e+00 : f32
    %339 = vector.shape_cast %11 : vector<16x1xi1> to vector<16x1xi1>
    %340 = vector.broadcast %339 : vector<16x1xi1> to vector<16x32xi1>
    %341 = vector.broadcast %cst_103 : f32 to vector<16x32xf32>
    %342 = arith.select %340, %338, %341 : vector<16x32xi1>, vector<16x32xf32>
    %343 = vector.extract_strided_slice %8 {offsets = [20, 0], sizes = [1, 64], strides = [1, 1]} : vector<56x128xf32> to vector<1x64xf32>
    %344 = arith.truncf %337 : vector<16x32xf32> to vector<16x32xbf16>
    %345 = vector.extract_strided_slice %330 {offsets = [0, 0], sizes = [32, 64], strides = [1, 1]} : vector<96x64xbf16> to vector<32x64xbf16>
    %cst_104 = arith.constant dense<0.000000e+00> : vector<16x64xf32>
    %346 = tpu.matmul %344, %345, %cst_104 {dimension_numbers = #tpu.dot_dimension_numbers<[1], [0], [0], [1], [0, 0, 1, 1], [], []>} : vector<16x32xbf16>, vector<32x64xbf16>, vector<16x64xf32> -> vector<16x64xf32>
    %347 = vector.broadcast %343 : vector<1x64xf32> to vector<16x64xf32>
    %348 = arith.addf %347, %346 : vector<16x64xf32>
    %349 = arith.truncf %342 : vector<16x32xf32> to vector<16x32xbf16>
    %350 = vector.extract_strided_slice %330 {offsets = [32, 0], sizes = [32, 64], strides = [1, 1]} : vector<96x64xbf16> to vector<32x64xbf16>
    %cst_105 = arith.constant dense<0.000000e+00> : vector<16x64xf32>
    %351 = tpu.matmul %349, %350, %cst_105 {dimension_numbers = #tpu.dot_dimension_numbers<[1], [0], [0], [1], [0, 0, 1, 1], [], []>} : vector<16x32xbf16>, vector<32x64xbf16>, vector<16x64xf32> -> vector<16x64xf32>
    %352 = arith.addf %348, %351 : vector<16x64xf32>
    %353 = arith.truncf %328 : vector<16x32xf32> to vector<16x32xbf16>
    %354 = vector.extract_strided_slice %330 {offsets = [64, 0], sizes = [32, 64], strides = [1, 1]} : vector<96x64xbf16> to vector<32x64xbf16>
    %cst_106 = arith.constant dense<0.000000e+00> : vector<16x64xf32>
    %355 = tpu.matmul %353, %354, %cst_106 {dimension_numbers = #tpu.dot_dimension_numbers<[1], [0], [0], [1], [0, 0, 1, 1], [], []>} : vector<16x32xbf16>, vector<32x64xbf16>, vector<16x64xf32> -> vector<16x64xf32>
    %356 = arith.addf %352, %355 : vector<16x64xf32>
    %cst_107 = arith.constant 0.000000e+00 : f32
    %357 = vector.broadcast %cst_107 : f32 to vector<16x64xf32>
    %358 = arith.maximumf %356, %357 : vector<16x64xf32>
    %359 = vector.broadcast %5 : vector<16x1xf32> to vector<16x64xf32>
    %360 = arith.mulf %358, %359 : vector<16x64xf32>
    %c2_i32_108 = arith.constant 2 : i32
    %361 = tpu.dynamic_rotate %360 by %c2_i32_108 dim 0 : vector<16x64xf32>, i32 -> vector<16x64xf32>
    %cst_109 = arith.constant 0.000000e+00 : f32
    %362 = vector.shape_cast %13 : vector<16x1xi1> to vector<16x1xi1>
    %363 = vector.broadcast %362 : vector<16x1xi1> to vector<16x64xi1>
    %364 = vector.broadcast %cst_109 : f32 to vector<16x64xf32>
    %365 = arith.select %363, %361, %364 : vector<16x64xi1>, vector<16x64xf32>
    %c1_i32_110 = arith.constant 1 : i32
    %366 = tpu.dynamic_rotate %360 by %c1_i32_110 dim 0 : vector<16x64xf32>, i32 -> vector<16x64xf32>
    %cst_111 = arith.constant 0.000000e+00 : f32
    %367 = vector.shape_cast %11 : vector<16x1xi1> to vector<16x1xi1>
    %368 = vector.broadcast %367 : vector<16x1xi1> to vector<16x64xi1>
    %369 = vector.broadcast %cst_111 : f32 to vector<16x64xf32>
    %370 = arith.select %368, %366, %369 : vector<16x64xi1>, vector<16x64xf32>
    %371 = vector.extract_strided_slice %8 {offsets = [21, 0], sizes = [1, 32], strides = [1, 1]} : vector<56x128xf32> to vector<1x32xf32>
    %372 = arith.truncf %365 : vector<16x64xf32> to vector<16x64xbf16>
    %373 = vector.extract_strided_slice %332 {offsets = [0, 0], sizes = [64, 32], strides = [1, 1]} : vector<192x32xbf16> to vector<64x32xbf16>
    %cst_112 = arith.constant dense<0.000000e+00> : vector<16x32xf32>
    %374 = tpu.matmul %372, %373, %cst_112 {dimension_numbers = #tpu.dot_dimension_numbers<[1], [0], [0], [1], [0, 0, 1, 1], [], []>} : vector<16x64xbf16>, vector<64x32xbf16>, vector<16x32xf32> -> vector<16x32xf32>
    %375 = vector.broadcast %371 : vector<1x32xf32> to vector<16x32xf32>
    %376 = arith.addf %375, %374 : vector<16x32xf32>
    %377 = arith.truncf %370 : vector<16x64xf32> to vector<16x64xbf16>
    %378 = vector.extract_strided_slice %332 {offsets = [64, 0], sizes = [64, 32], strides = [1, 1]} : vector<192x32xbf16> to vector<64x32xbf16>
    %cst_113 = arith.constant dense<0.000000e+00> : vector<16x32xf32>
    %379 = tpu.matmul %377, %378, %cst_113 {dimension_numbers = #tpu.dot_dimension_numbers<[1], [0], [0], [1], [0, 0, 1, 1], [], []>} : vector<16x64xbf16>, vector<64x32xbf16>, vector<16x32xf32> -> vector<16x32xf32>
    %380 = arith.addf %376, %379 : vector<16x32xf32>
    %381 = arith.truncf %360 : vector<16x64xf32> to vector<16x64xbf16>
    %382 = vector.extract_strided_slice %332 {offsets = [128, 0], sizes = [64, 32], strides = [1, 1]} : vector<192x32xbf16> to vector<64x32xbf16>
    %cst_114 = arith.constant dense<0.000000e+00> : vector<16x32xf32>
    %383 = tpu.matmul %381, %382, %cst_114 {dimension_numbers = #tpu.dot_dimension_numbers<[1], [0], [0], [1], [0, 0, 1, 1], [], []>} : vector<16x64xbf16>, vector<64x32xbf16>, vector<16x32xf32> -> vector<16x32xf32>
    %384 = arith.addf %380, %383 : vector<16x32xf32>
    %385 = vector.broadcast %5 : vector<16x1xf32> to vector<16x32xf32>
    %386 = arith.mulf %384, %385 : vector<16x32xf32>
    %387 = arith.addf %326, %386 : vector<16x32xf32>
    %388 = vector.extract_strided_slice %8 {offsets = [22, 0], sizes = [1, 32], strides = [1, 1]} : vector<56x128xf32> to vector<1x32xf32>
    %389 = vector.extract_strided_slice %8 {offsets = [23, 0], sizes = [1, 32], strides = [1, 1]} : vector<56x128xf32> to vector<1x32xf32>
    %cst_115 = arith.constant dense<0.000000e+00> : vector<16xf32>
    %390 = vector.multi_reduction <add>, %387, %cst_115 [1] : vector<16x32xf32> to vector<16xf32>
    %391 = vector.shape_cast %390 : vector<16xf32> to vector<16x1xf32>
    %cst_116 = arith.constant 3.200000e+01 : f32
    %392 = vector.broadcast %cst_116 : f32 to vector<16x1xf32>
    %393 = arith.divf %391, %392 : vector<16x1xf32>
    %394 = vector.broadcast %393 : vector<16x1xf32> to vector<16x32xf32>
    %395 = arith.subf %387, %394 : vector<16x32xf32>
    %396 = arith.mulf %395, %395 : vector<16x32xf32>
    %cst_117 = arith.constant dense<0.000000e+00> : vector<16xf32>
    %397 = vector.multi_reduction <add>, %396, %cst_117 [1] : vector<16x32xf32> to vector<16xf32>
    %398 = vector.shape_cast %397 : vector<16xf32> to vector<16x1xf32>
    %cst_118 = arith.constant 3.200000e+01 : f32
    %399 = vector.broadcast %cst_118 : f32 to vector<16x1xf32>
    %400 = arith.divf %398, %399 : vector<16x1xf32>
    %401 = vector.broadcast %393 : vector<16x1xf32> to vector<16x32xf32>
    %402 = arith.subf %387, %401 : vector<16x32xf32>
    %cst_119 = arith.constant 9.99999974E-6 : f32
    %403 = vector.broadcast %cst_119 : f32 to vector<16x1xf32>
    %404 = arith.addf %400, %403 : vector<16x1xf32>
    %405 = math.rsqrt %404 : vector<16x1xf32>
    %406 = vector.broadcast %405 : vector<16x1xf32> to vector<16x32xf32>
    %407 = arith.mulf %402, %406 : vector<16x32xf32>
    %408 = vector.broadcast %388 : vector<1x32xf32> to vector<16x32xf32>
    %409 = arith.mulf %407, %408 : vector<16x32xf32>
    %410 = vector.broadcast %389 : vector<1x32xf32> to vector<16x32xf32>
    %411 = arith.addf %409, %410 : vector<16x32xf32>
    %412 = vector.broadcast %5 : vector<16x1xf32> to vector<16x32xf32>
    %413 = arith.mulf %411, %412 : vector<16x32xf32>
    %414 = vector.extract_strided_slice %8 {offsets = [24, 0], sizes = [32, 128], strides = [1, 1]} : vector<56x128xf32> to vector<32x128xf32>
    %415 = arith.truncf %413 : vector<16x32xf32> to vector<16x32xbf16>
    %416 = arith.truncf %414 : vector<32x128xf32> to vector<32x128xbf16>
    %cst_120 = arith.constant dense<0.000000e+00> : vector<16x128xf32>
    %417 = tpu.matmul %415, %416, %cst_120 {dimension_numbers = #tpu.dot_dimension_numbers<[1], [0], [0], [1], [0, 0, 1, 1], [], []>} : vector<16x32xbf16>, vector<32x128xbf16>, vector<16x128xf32> -> vector<16x128xf32>
    %418 = vector.extract_strided_slice %8 {offsets = [3, 0], sizes = [1, 128], strides = [1, 1]} : vector<56x128xf32> to vector<1x128xf32>
    %419 = vector.broadcast %418 : vector<1x128xf32> to vector<16x128xf32>
    %420 = arith.addf %417, %419 : vector<16x128xf32>
    %421 = vector.broadcast %5 : vector<16x1xf32> to vector<16x128xf32>
    %422 = arith.mulf %420, %421 : vector<16x128xf32>
    %c0_121 = arith.constant 0 : index
    %c0_122 = arith.constant 0 : index
    %c0_123 = arith.constant 0 : index
    %423 = vector.load %arg10[%c0_121, %c0_122, %c0_123] : memref<1x16x128xf32, #tpu.memory_space<vmem>>, vector<1x16x128xf32>
    %424 = vector.shape_cast %423 : vector<1x16x128xf32> to vector<16x128xf32>
    %425 = vector.shape_cast %422 : vector<16x128xf32> to vector<1x16x128xf32>
    tpu.vector_store %arg10[%c0_121, %c0_122, %c0_123], %425 {strides = array<i32>} : memref<1x16x128xf32, #tpu.memory_space<vmem>>, vector<1x16x128xf32>,
    return
  }
  func.func @transform_0(%arg0: i32) -> (i32, i32, i32) {
    %c0_i32 = arith.constant 0 : i32
    %c0_i32_0 = arith.constant 0 : i32
    %c0_i32_1 = arith.constant 0 : i32
    return %arg0, %c0_i32, %c0_i32_0 : i32, i32, i32
  }
  func.func @transform_1(%arg0: i32) -> (i32, i32, i32) {
    %c0_i32 = arith.constant 0 : i32
    %c0_i32_0 = arith.constant 0 : i32
    %c0_i32_1 = arith.constant 0 : i32
    return %arg0, %c0_i32, %c0_i32_0 : i32, i32, i32
  }
  func.func @transform_2(%arg0: i32) -> (i32, i32, i32) {
    %c0_i32 = arith.constant 0 : i32
    %c0_i32_0 = arith.constant 0 : i32
    %c0_i32_1 = arith.constant 0 : i32
    return %arg0, %c0_i32, %c0_i32_0 : i32, i32, i32
  }
  func.func @transform_3(%arg0: i32) -> (i32, i32, i32) {
    %c0_i32 = arith.constant 0 : i32
    %c0_i32_0 = arith.constant 0 : i32
    %c0_i32_1 = arith.constant 0 : i32
    return %arg0, %c0_i32, %c0_i32_0 : i32, i32, i32
  }
  func.func @transform_4(%arg0: i32) -> (i32, i32) {
    %c0_i32 = arith.constant 0 : i32
    %c0_i32_0 = arith.constant 0 : i32
    %c0_i32_1 = arith.constant 0 : i32
    return %c0_i32, %c0_i32_0 : i32, i32
  }
  func.func @transform_5(%arg0: i32) -> (i32, i32) {
    %c0_i32 = arith.constant 0 : i32
    %c0_i32_0 = arith.constant 0 : i32
    %c0_i32_1 = arith.constant 0 : i32
    return %c0_i32, %c0_i32_0 : i32, i32
  }
  func.func @transform_6(%arg0: i32) -> (i32, i32, i32) {
    %c0_i32 = arith.constant 0 : i32
    %c0_i32_0 = arith.constant 0 : i32
    %c0_i32_1 = arith.constant 0 : i32
    %c0_i32_2 = arith.constant 0 : i32
    return %c0_i32, %c0_i32_0, %c0_i32_1 : i32, i32, i32
  }
  func.func @transform_7(%arg0: i32) -> (i32, i32, i32) {
    %c0_i32 = arith.constant 0 : i32
    %c0_i32_0 = arith.constant 0 : i32
    %c0_i32_1 = arith.constant 0 : i32
    %c0_i32_2 = arith.constant 0 : i32
    return %c0_i32, %c0_i32_0, %c0_i32_1 : i32, i32, i32
  }
  func.func @transform_8(%arg0: i32) -> (i32, i32, i32) {
    %c0_i32 = arith.constant 0 : i32
    %c0_i32_0 = arith.constant 0 : i32
    %c0_i32_1 = arith.constant 0 : i32
    %c0_i32_2 = arith.constant 0 : i32
    return %c0_i32, %c0_i32_0, %c0_i32_1 : i32, i32, i32
  }
  func.func @transform_9(%arg0: i32) -> (i32, i32, i32) {
    %c0_i32 = arith.constant 0 : i32
    %c0_i32_0 = arith.constant 0 : i32
    %c0_i32_1 = arith.constant 0 : i32
    return %arg0, %c0_i32, %c0_i32_0 : i32, i32, i32
  }
}

</mosaic_0001>

<bundles_post_ra>
// kernel: f0_decoder_forward.1
= control target key start
LH: loop header
LB: loop body
LE: loop exit
PB: predicated region body
PF: predicated region fallthrough
CT: control target
= control target key end

     0   :  { %s3306_s30 = smov 0   ;;  %s3949_s0 = inlined_call_operand.vmem [shape: f32[2,16,32], index: 0, kind: input, shape index: {}]   ;;  %s3950_s1 = inlined_call_operand.vmem [shape: f32[2,16,1], index: 1, kind: input, shape index: {}]   ;;  %s3951_s2 = inlined_call_operand.vmem [shape: f32[2,16,1], index: 2, kind: input, shape index: {}]   ;;  %s3952_s3 = inlined_call_operand.vmem [shape: f32[2,1,16], index: 3, kind: input, shape index: {}]   ;;  %s3953_s4 = inlined_call_operand.vmem [shape: bf16[112,32], index: 4, kind: input, shape index: {}]   ;;  %s3954_s5 = inlined_call_operand.vmem [shape: f32[56,128], index: 5, kind: input, shape index: {}]   ;;  %s3955_s6 = inlined_call_operand.vmem [shape: bf16[2,32,128], index: 6, kind: input, shape index: {}]   ;;  %s3956_s7 = inlined_call_operand.vmem [shape: bf16[2,96,64], index: 7, kind: input, shape index: {}]   ;;  %s3957_s8 = inlined_call_operand.vmem [shape: bf16[2,192,32], index: 8, kind: input, shape index: {}]   ;;  %s3958_s9 = inlined_call_operand.vmem [shape: f32[2,16,128], index: 9, kind: output, shape index: {}]  }
   0x1 LB: > { %s2637_s10 = sadd.s32 4294967295, %s3246_s30   ;;  %p2641_p0 = scmp.ge.s32.totalorder %s3246_s30, 1  ;;  %s3246_s30 = sphi %s3306_s30, %s19_s30  }
   0x2   : > { %p315_p1 = scmp.lt.s32.totalorder %s3246_s30, 3 }
   0x4   : > { %p316_p2 = pnand %p2641_p0, %p315_p1 }
   0x5   : > { %v3144_v0 = vld [vmem:[%s3953_s4] sm:$0xff] (!%p316_p2)   ;;  %v3248_v1 = vmov (!%p316_p2), 0.0   ;;  %p364_p3 = scmp.lt.s32.totalorder (!%p316_p2), %s2637_s10, 1  ;;  %vm3249_vm0 = vmmov (!%p316_p2), 0   ;;  %v3250_v2 = vmov (!%p316_p2), 0   ;;  %vm424_vm1 = vcmask (!%p316_p2), 130048  }
   0x6   : > { %319 = sbr.rel (%p316_p2) target bundleno = 5189 (0x1445), region = 56  ;;  %2854 = vmatprep.subr.bf16.mxu0 (!%p316_p2), %v3248_v1  ;;  %2860 = vmatprep.subr.bf16.mxu1 (!%p316_p2), %v3248_v1  ;;  %v3145_v7 = vld [vmem:[%s3953_s4 + $0x8] sm:$0xff] (!%p316_p2)   ;;  %v3146_v8 = vld [vmem:[%s3953_s4 + $0x10] sm:$0xff] (!%p316_p2)   ;;  %v402_v11 = vlaneseq (!%p316_p2)  ;;  %v3357_v15 = vld [vmem:[%s3954_s5] sm:$0xff] (!%p316_p2)  ;;  %vm565_vm6 = vcmask (!%p316_p2), 261120   ;;  %s3251_s27 = smov (!%p316_p2), 80  }
   0x7   : > { %2855 = vmatpush3.bf16.msra.mxu0 (!%p316_p2), %v3144_v0  ;;  %2856 = vmatprep.mubr.msk.bf16.mxu0 (!%p316_p2), %vm3249_vm0, %v3248_v1  ;;  %s3252_s28 = smov (!%p316_p2), 96   ;;  %s3253_s29 = smov (!%p316_p2), 112   ;;  %vm1391_vm11 = vcmask (!%p316_p2), 523264  }
   0x8   : > { %3142 = vset.pattern.permute.xlu0 (!%p316_p2), %v3250_v2  ;;  %2864 = vmatprep.mubr.msk.bf16.mxu1 (!%p316_p2), %vm3249_vm0, %v3248_v1  ;;  %v3349_v12 = vshrl.u32 (!%p316_p2), %v402_v11, 7 }
   0x9   : > { %3143 = vset.pattern.permute.xlu1 (!%p316_p2), %v3250_v2  ;;  %2892 = vmatprep.subr.bf16.mxu0 (!%p316_p2), %v3248_v1  ;;  %v3147_v2 = vld [vmem:[%s3953_s4 + $0x18] sm:$0xff] (!%p316_p2)  }
   0xa   : > { %2861 = vmatpush3.bf16.msra.mxu1 (!%p316_p2), %v3145_v7  ;;  %v3352_v14 = vsub.s32 (!%p316_p2), 4, %v3349_v12  ;;  %v3362_v17 = vsub.s32 (!%p316_p2), 6, %v3349_v12  ;;  %v3367_v22 = vsub.s32 (!%p316_p2), 5, %v3349_v12  ;;  %vm492_vm2 = vcmp.lt.s32.totalorder (!%p316_p2), %v3349_v12, 1 }
   0xb   : > { %2862 = vmatprep.subr.bf16.mxu1 (!%p316_p2), %v3248_v1  ;;  %v3373_v28 = vadd.s32 (!%p316_p2), 8, %v3349_v12  ;;  %vm405_vm3 = vcmp.ge.s32.totalorder (!%p316_p2), %v3349_v12, 1  ;;  %vm517_vm4 = vcmp.lt.s32.totalorder (!%p316_p2), %v3349_v12, 7  ;;  %v3387_v39 = vsub.s32 (!%p316_p2), 1, %v3349_v12 }
   0xc   : > { %v487_v16 = vrot.slane (!%p316_p2), %v3357_v15, %v3352_v14  ;;  %v512_v19 = vrot.slane (!%p316_p2), %v3357_v15, %v3362_v17  ;;  %v504_v27 = vrot.slane (!%p316_p2), %v3357_v15, %v3367_v22  ;;  %v3398_v42 = vsub.s32 (!%p316_p2), 0, %v3349_v12 }
   0xd   : > { %s3960_s10 = smov (!%p364_p3, %s2637_s10), 1  ;;  %vm410_vm5 = vcmp.lt.s32.totalorder %v3373_v28, 15  ;;  %v531_v47 = vrot.slane %v3357_v15, %v3387_v39  ;;  %vm1154_vm9 = vcmp.lt.s32.totalorder %v3349_v12, 2  ;;  %vm407_vm10 = vcmp.ge.s32.totalorder %v3349_v12, 2 }
   0xe   : > { %s381_s15 = scalar_lea.vmem %s3952_s3, %s3960_s10  ;;  %s3327_s16 = sshll.u32 %s3960_s10, 4  ;;  %2863 = vmatpush3.bf16.msra.mxu1 %v3146_v8 }
   0xf   : > { %v394_v3 = vld [vmem:[%s381_s15] sm:$0x1]  ;;  %s373_s19 = scalar_lea.vmem %s3950_s1, %s3327_s16  ;;  %2868 = vmatprep.subr.bf16.mxu1 %v3248_v1  ;;  %s378_s26 = scalar_lea.vmem %s3951_s2, %s3327_s16 }
  0x10   : > { %v415_v4 = vpack.c.bf16 %v394_v3, %v394_v3  ;;  %v390_v5 = vld [vmem:[%s373_s19] sm:$0xff]  ;;  %v391_v6 = vld [vmem:[%s373_s19 + $0x8] sm:$0xff]  ;;  %s368_s11 = scalar_lea.vmem %s3949_s0, %s3327_s16  ;;  %s3254_s10 = smov 64  }
  0x11   : > { %476 = vperm.xlu0 %3142, %v390_v5   ;;  %v392_v9 = vld [vmem:[%s378_s26] sm:$0xff]  ;;  %v393_v10 = vld [vmem:[%s378_s26 + $0x8] sm:$0xff]  ;;  %s386_s18 = scalar_lea.vmem %s3958_s9, %s3327_s16 }
  0x12   : > { %2857 = vmatmul.mubr.msk.bf16.vlgmr.msra.gmra.mrb[0].mxu0 %vm424_vm1, %v415_v4  ;;  %744 = vperm.xlu1 %3143, %v392_v9   ;;  %v388_v49 = vld [vmem:[%s368_s11] sm:$0xff]  ;;  %v389_v50 = vld [vmem:[%s368_s11 + $0x8] sm:$0xff]  ;;  %v3150_v9 = vld [vmem:[%s3953_s4 + $0x30] sm:$0xff]   ;;  %s3255_s11 = smov 32  }
  0x13   : > { %2894 = vmatprep.mubr.msk.bf16.mxu0 %vm3249_vm0, %v3248_v1  ;;  %v3148_v4 = vld [vmem:[%s3953_s4 + $0x20] sm:$0xff]   ;;  %v3149_v5 = vld [vmem:[%s3953_s4 + $0x28] sm:$0xff]  }
  0x15   : > { %481 = vperm.xlu0 %3142, %v391_v6  }
  0x16   : > { %749 = vperm.xlu1 %3143, %v393_v10  }
  0x90   : > { %v477_v13 = vpop.permute.xlu0 %476 }
  0x91   : > { %v488_v20 = vmul.f32 %v487_v16, %v477_v13  ;;  %v513_v24 = vmul.f32 %v512_v19, %v477_v13  ;;  %v505_v32 = vmul.f32 %v504_v27, %v477_v13 }
  0x93   : > { %v490_v23 = vrot.slane %v488_v20, 7  ;;  %v515_v29 = vrot.slane %v513_v24, 1  ;;  %v3152_v20 = vld [vmem:[%s3955_s6 + $0x8] sm:$0xff]   ;;  %v3454_v24 = vpop.permute.xlu1 %744 }
  0x94   : > { %v482_v18 = vpop.permute.xlu0 %481 }
  0x95   : > { %v489_v21 = vmul.f32 %v487_v16, %v482_v18  ;;  %v514_v26 = vmul.f32 %v512_v19, %v482_v18  ;;  %v506_v33 = vmul.f32 %v504_v27, %v482_v18  ;;  %v3151_v19 = vld [vmem:[%s3955_s6] sm:$0xff]  }
  0x97   : > { %v491_v25 = vrot.slane %v489_v21, 7  ;;  %v516_v31 = vrot.slane %v514_v26, 1  ;;  %v3450_v21 = vsub.s32 2, %v3349_v12 }
  0x99   : > { %v494_v30 = vsel %vm492_vm2, %v491_v25, %v490_v23  ;;  %v493_v34 = vsel %vm492_vm2, %v490_v23, %v491_v25  ;;  %v519_v36 = vsel %vm517_vm4, %v516_v31, %v515_v29  ;;  %v518_v40 = vsel %vm517_vm4, %v515_v29, %v516_v31 }
  0x9a   : > { %v499_v35 = vsel %vm405_vm3, %v494_v30, 0.0  ;;  %v508_v38 = vadd.f32 %v506_v33, %v493_v34  ;;  %v525_v41 = vsel %vm410_vm5, %v519_v36, 0.0  ;;  %v613_v23 = vrot.slane %v3357_v15, %v3450_v21  ;;  %v3457_v33 = vpop.permute.xlu1 %749 }
  0x9b   : > { %v507_v37 = vadd.f32 %v505_v32, %v499_v35 }
  0x9c   : > { %v527_v45 = vadd.f32 %v525_v41, %v508_v38 }
  0x9d   : > { %v526_v44 = vadd.f32 %v518_v40, %v507_v37  ;;  %v3474_v37 = vld [vmem:[%s3954_s5 + $0x8] sm:$0xff] }
  0x9e   : > { %v533_v57 = vadd.f32 %v531_v47, %v527_v45  ;;  %v764_v38 = vrot.slane %v3474_v37, %v3398_v42 }
  0x9f   : > { %v532_v56 = vadd.f32 %v531_v47, %v526_v44 }
  0xe5   : > { %v462_v43 = vpop.f32.mrb[0].mxu0 }
  0xe6   : > { %v463_v46 = vadd.f32 %v462_v43, %v3357_v15  ;;  %v2858_v48 = vpop.f32.mrb[1].mxu0 }
  0xe7   : > { %v465_v51 = vpop.f32.mrb[2].mxu0 }
  0xe8   : > { %v471_v52 = vrot.slane %v463_v46, %v3398_v42  ;;  %v2859_v53 = vpop.f32.mrb[3].mxu0 }
  0xe9   : > { %v3498_v53 = vand.u32 127, %v402_v11 }
  0xea   : > { %v472_v54 = vadd.f32 %v471_v52, %v388_v49  ;;  %v473_v55 = vadd.f32 %v471_v52, %v389_v50 }
  0xeb   : > { %vm413_vm7 = vcmp.le.s32.totalorder %v3498_v53, %v3349_v12  ;;  %vm414_vm8 = vcmp.le.s32.totalorder %v3498_v53, %v3373_v28 }
  0xec   : > { %v534_v58 = vadd.f32 %v532_v56, %v472_v54  ;;  %v535_v59 = vadd.f32 %v533_v57, %v473_v55 }
  0xee   : > { %v536_v60 = vrot.slane %v534_v58, 7  ;;  %v537_v61 = vrot.slane %v535_v59, 7  ;;  %v620_v6 = vpack.c.bf16 %v535_v59, %v534_v58  ;;  %v542_v7 = vrot.slane %v534_v58, 1 }
  0xef   : > { %v543_v8 = vrot.slane %v535_v59, 1 }
  0xf0   : > { %v538_v62 = vsel %vm492_vm2, %v536_v60, %v537_v61  ;;  %v539_v63 = vsel %vm492_vm2, %v537_v61, %v536_v60 }
  0xf1   : > { %v540_v0 = vsel %vm405_vm3, %v539_v63, 0.0  ;;  %v545_v10 = vsel %vm517_vm4, %v543_v8, %v542_v7  ;;  %v544_v13 = vsel %vm517_vm4, %v542_v7, %v543_v8 }
  0xf2   : > { %v552_v3 = vpack.c.bf16 %v538_v62, %v540_v0  ;;  %v547_v16 = vsel %vm410_vm5, %v545_v10, 0.0 }
  0xf3   : > { %v683_v18 = vpack.c.bf16 %v547_v16, %v544_v13 }
  0xf4   : > { %2865 = vmatmul.mubr.msk.bf16.vlgmr.msra.gmra.mrb[0].mxu1 %vm565_vm6, %v552_v3 }
  0xf5   : > { %2869 = vmatpush3.bf16.msra.mxu1 %v3147_v2  ;;  %2872 = vmatprep.mubr.msk.bf16.mxu1 %vm3249_vm0, %v3248_v1 }
  0xf6   : > { %2870 = vmatprep.subr.bf16.mxu1 %v3248_v1 }
  0xf9   : > { %2871 = vmatpush3.bf16.msra.mxu1 %v3148_v4 }
  0xfa   : > { %2876 = vmatprep.subr.bf16.mxu1 %v3248_v1 }
 0x100   : > { %2873 = vmatmul.mubr.msk.bf16.vlgmr.msra.gmra.mrb[0].mxu1 %vm565_vm6, %v620_v6 }
 0x101   : > { %2877 = vmatpush3.bf16.msra.mxu1 %v3149_v5  ;;  %2880 = vmatprep.mubr.msk.bf16.mxu1 %vm3249_vm0, %v3248_v1 }
 0x102   : > { %2878 = vmatprep.subr.bf16.mxu1 %v3248_v1 }
 0x105   : > { %2879 = vmatpush3.bf16.msra.mxu1 %v3150_v9 }
 0x106   : > { %2884 = vmatprep.subr.bf16.mxu1 %v3248_v1 }
 0x10c   : > { %2881 = vmatmul.mubr.msk.bf16.vlgmr.msra.gmra.mrb[0].mxu1 %vm565_vm6, %v683_v18 }
 0x10d   : > { %2888 = vmatprep.mubr.msk.bf16.mxu1 %vm3249_vm0, %v3248_v1  ;;  %2885 = vmatpush3.bf16.msra.mxu1 %v3151_v19 }
 0x10e   : > { %2886 = vmatprep.subr.bf16.mxu1 %v3248_v1 }
 0x111   : > { %2887 = vmatpush3.bf16.msra.mxu1 %v3152_v20 }
 0x112   : > { %2904 = vmatprep.subr.bf16.mxu1 %v3248_v1 }
 0x1df   : > { %v733_v25 = vpop.f32.mrb[0].mxu1 }
 0x1e0   : > { %v3076_v26 = vadd.f32 %v733_v25, %v613_v23  ;;  %v2882_v27 = vpop.f32.mrb[1].mxu1 }
 0x1e1   : > { %v736_v29 = vpop.f32.mrb[2].mxu1 }
 0x1e2   : > { %v752_v30 = vmul.f32 %v3076_v26, %v3454_v24  ;;  %v3077_v31 = vadd.f32 %v736_v29, %v613_v23  ;;  %v2883_v32 = vpop.f32.mrb[3].mxu1 }
 0x1e4   : > { %v753_v34 = vmul.f32 %v3077_v31, %v3457_v33  ;;  %v3461_v35 = vmul.f32 %v752_v30, %v3454_v24 }
 0x1e6   : > { %v3464_v36 = vmul.f32 %v753_v34, %v3457_v33 }
 0x1e8   : > { %v760_v15 = vpack.c.bf16 %v3464_v36, %v3461_v35 }
 0x1ea   : > { %2889 = vmatmul.mubr.msk.bf16.vlgmr.msra.gmra.mrb[4].mxu1 %vm565_vm6, %v760_v15 }
 0x1eb   : > { %2906 = vmatprep.mubr.msk.bf16.mxu1 %vm3249_vm0, %v3248_v1 }
 0x2bd   : > { %v814_v40 = vpop.f32.mrb[4].mxu1 }
 0x2be   : > { %v2890_v41 = vpop.f32.mrb[5].mxu1  ;;  %v815_v44 = vadd.f32 %v814_v40, %v764_v38 }
 0x2bf   : > { %v817_v43 = vpop.f32.mrb[6].mxu1 }
 0x2c0   : > { %v818_v45 = vadd.f32 %v817_v43, %v764_v38  ;;  %v2891_v46 = vpop.f32.mrb[7].mxu1 }
 0x2c2   : > { %v3478_v47 = vpack.c.bf16 %v818_v45, %v815_v44 }
 0x2c4   : > { %899 = vrot.lane.b32.xlu1 %v3478_v47, %s3251_s27  ;;  %823 = vrot.lane.b32.xlu0 %v3478_v47, %s3252_s28 }
 0x2c8   : > { %897 = vrot.lane.b32.xlu0 %v3478_v47, %s3253_s29 }
 0x336   : > { %v824_v48 = vpop.permute.xlu0 %823  ;;  %v900_v50 = vpop.permute.xlu1 %899 }
 0x337   : > { %v829_v49 = vsel %vm424_vm1, %v824_v48, 0  ;;  %v905_v51 = vsel %vm424_vm1, %v900_v50, 0 }
 0x338   : > { %2893 = vmatpush3.bf16.xpose.msra.mxu0 %v829_v49 }
 0x339   : > { %2898 = vmatprep.subr.bf16.mxu0 %v3248_v1 }
 0x33a   : > { %v898_v52 = vpop.permute.xlu0 %897 }
 0x33f   : > { %2895 = vmatmul.mubr.msk.bf16.vlgmr.msra.gmra.mrb[4].mxu0 %vm424_vm1, %v3478_v47 }
 0x340   : > { %2899 = vmatpush3.bf16.xpose.msra.mxu0 %v905_v51  ;;  %2900 = vmatprep.mubr.msk.bf16.mxu0 %vm3249_vm0, %v3248_v1 }
 0x341   : > { %2910 = vmatprep.subr.bf16.mxu0 %v3248_v1 }
 0x347   : > { %2901 = vmatmul.mubr.msk.bf16.vlgmr.msra.gmra.mrb[8].mxu0 %vm424_vm1, %v898_v52 }
 0x348   : > { %2912 = vmatprep.mubr.msk.bf16.mxu0 %vm3249_vm0, %v3248_v1 }
 0x412   : > { %v865_v54 = vpop.f32.mrb[4].mxu0 }
 0x413   : > { %v872_v55 = vsel %vm413_vm7, %v865_v54, -10000.0  ;;  %v2896_v56 = vpop.f32.mrb[5].mxu0 }
 0x414   : > { %v868_v57 = vpop.f32.mrb[6].mxu0  ;;  %v874_v58 = vsel %vm424_vm1, %v872_v55, -inf }
 0x415   : > { %v873_v11 = vsel %vm414_vm8, %v868_v57, -10000.0  ;;  %875 = vmax.xlane.f32.xlu1 %v874_v58  ;;  %v2897_v59 = vpop.f32.mrb[7].mxu0 }
 0x416   : > { %v877_v60 = vsel %vm424_vm1, %v873_v11, -inf }
 0x417   : > { %878 = vmax.xlane.f32.xlu0 %v877_v60  ;;  %v1070_v60 = vrot.slane %v3474_v37, %v3387_v39 }
 0x41a   : > { %v941_v61 = vpop.f32.mrb[8].mxu0 }
 0x41b   : > { %v948_v62 = vsel %vm413_vm7, %v941_v61, -10000.0  ;;  %v2902_v63 = vpop.f32.mrb[9].mxu0 }
 0x41c   : > { %v944_v0 = vpop.f32.mrb[10].mxu0  ;;  %v950_v2 = vsel %vm424_vm1, %v948_v62, -inf }
 0x41d   : > { %v949_v3 = vsel %vm414_vm8, %v944_v0, -10000.0  ;;  %951 = vmax.xlane.f32.xlu0 %v950_v2  ;;  %v2903_v4 = vpop.f32.mrb[11].mxu0 }
 0x41e   : > { %v953_v5 = vsel %vm424_vm1, %v949_v3, -inf }
 0x41f   : > { %954 = vmax.xlane.f32.xlu1 %v953_v5 }
 0x4a2   : > { %v876_v6 = vpop.xlane.xlu1 %875 }
 0x4a3   : > { %v880_v7 = vsub.f32 %v872_v55, %v876_v6 }
 0x4a4   : > { %v879_v8 = vpop.xlane.xlu0 %878 }
 0x4a5   : > { %v882_v9 = vmul.f32 1.442695, %v880_v7  ;;  %v881_v10 = vsub.f32 %v873_v11, %v879_v8 }
 0x4a7   : > { %3191 = vpow2.f32 %v882_v9  ;;  %v884_v13 = vmul.f32 1.442695, %v881_v10 }
 0x4a9   : > { %3193 = vpow2.f32 %v884_v13 }
 0x4aa   : > { %v952_v16 = vpop.xlane.xlu0 %951 }
 0x4ab   : > { %v956_v18 = vsub.f32 %v948_v62, %v952_v16 }
 0x4ac   : > { %v955_v19 = vpop.xlane.xlu1 %954 }
 0x4ad   : > { %v958_v20 = vmul.f32 1.442695, %v956_v18  ;;  %v957_v23 = vsub.f32 %v949_v3, %v955_v19 }
 0x4af   : > { %3195 = vpow2.f32 %v958_v20  ;;  %v960_v25 = vmul.f32 1.442695, %v957_v23 }
 0x4b1   : > { %v3192_v26 = vpop.eup %3191  ;;  %3197 = vpow2.f32 %v960_v25 }
 0x4b2   : > { %v886_v27 = vsel %vm424_vm1, %v3192_v26, 0.0 }
 0x4b3   : > { %v3194_v29 = vpop.eup %3193  ;;  %887 = vadd.xlane.f32.xlu0 %v886_v27  ;;  %v3154_v27 = vld [vmem:[%s3956_s7 + $0x8] sm:$0xff]  }
 0x4b4   : > { %v889_v30 = vsel %vm424_vm1, %v3194_v29, 0.0 }
 0x4b5   : > { %890 = vadd.xlane.f32.xlu1 %v889_v30 }
 0x4b9   : > { %v3196_v31 = vpop.eup %3195 }
 0x4ba   : > { %v962_v32 = vsel %vm424_vm1, %v3196_v31, 0.0 }
 0x4bb   : > { %v3198_v34 = vpop.eup %3197  ;;  %963 = vadd.xlane.f32.xlu0 %v962_v32 }
 0x4bc   : > { %v965_v15 = vsel %vm424_vm1, %v3198_v34, 0.0 }
 0x4bd   : > { %966 = vadd.xlane.f32.xlu1 %v965_v15 }
 0x4ce   : > { %1020 = vrot.lane.b32.xlu1 %v3478_v47, %s3254_s10 }
 0x4d1   : > { %973 = vrot.lane.b32.xlu0 %v3478_v47, %s3255_s11 }
 0x540   : > { %v888_v38 = vpop.xlane.xlu0 %887 }
 0x541   : > { %3199 = vrcp.f32 %v888_v38 }
 0x542   : > { %v891_v40 = vpop.xlane.xlu1 %890 }
 0x543   : > { %3201 = vrcp.f32 %v891_v40  ;;  %v3557_v40 = vsub.s32 3, %v3349_v12 }
 0x548   : > { %v964_v41 = vpop.xlane.xlu0 %963 }
 0x549   : > { %3203 = vrcp.f32 %v964_v41  ;;  %v1105_v41 = vrot.slane %v3474_v37, %v3450_v21 }
 0x54a   : > { %v967_v43 = vpop.xlane.xlu1 %966 }
 0x54b   : > { %v3200_v44 = vpop.eup %3199  ;;  %3205 = vrcp.f32 %v967_v43 }
 0x54c   : > { %v974_v45 = vpop.permute.xlu0 %973  ;;  %v894_v48 = vmul.f32 %v3200_v44, %v3192_v26  ;;  %v1111_v44 = vrot.slane %v3474_v37, %v3557_v40 }
 0x54d   : > { %v3202_v46 = vpop.eup %3201  ;;  %2905 = vmatpush3.bf16.msra.mxu1 %v974_v45 }
 0x54e   : > { %v895_v49 = vmul.f32 %v3202_v46, %v3194_v29  ;;  %v1021_v50 = vpop.permute.xlu1 %1020  ;;  %2916 = vmatprep.subr.bf16.mxu1 %v3248_v1  ;;  %v3159_v29 = vld [vmem:[%s3957_s8] sm:$0xff]  }
 0x54f   : > { %2911 = vmatpush3.bf16.msra.mxu0 %v1021_v50 }
 0x550   : > { %v896_v51 = vpack.c.bf16 %v895_v49, %v894_v48  ;;  %2940 = vmatprep.subr.bf16.mxu0 %v3248_v1 }
 0x552   : > { %2913 = vmatmul.mubr.msk.bf16.vlgmr.msra.gmra.mrb[12].mxu0 %vm424_vm1, %v896_v51 }
 0x553   : > { %v3204_v47 = vpop.eup %3203  ;;  %2948 = vmatprep.mubr.msk.bf16.mxu0 %vm3249_vm0, %v3248_v1  ;;  %2941 = vmatpush3.bf16.msra.mxu0 %v3159_v29 }
 0x554   : > { %v970_v54 = vmul.f32 %v3204_v47, %v3196_v31  ;;  %2942 = vmatprep.subr.bf16.mxu0 %v3248_v1 }
 0x555   : > { %v3206_v52 = vpop.eup %3205 }
 0x556   : > { %v971_v55 = vmul.f32 %v3206_v52, %v3198_v34 }
 0x558   : > { %v972_v56 = vpack.c.bf16 %v971_v55, %v970_v54 }
 0x55a   : > { %2907 = vmatmul.mubr.msk.bf16.vlgmr.msra.gmra.mrb[8].mxu1 %vm424_vm1, %v972_v56 }
 0x55b   : > { %2920 = vmatprep.mubr.msk.bf16.mxu1 %vm3249_vm0, %v3248_v1 }
 0x625   : > { %v1060_v57 = vpop.f32.mrb[12].mxu0 }
 0x626   : > { %v2914_v58 = vpop.f32.mrb[13].mxu0 }
 0x627   : > { %v1063_v11 = vpop.f32.mrb[14].mxu0 }
 0x628   : > { %v2915_v59 = vpop.f32.mrb[15].mxu0 }
 0x629   : > { %v3155_v59 = vld [vmem:[%s3956_s7 + $0x10] sm:$0xff]  }
 0x62d   : > { %v1013_v61 = vpop.f32.mrb[8].mxu1 }
 0x62e   : > { %v1061_v62 = vadd.f32 %v1060_v57, %v1013_v61  ;;  %v2908_v63 = vpop.f32.mrb[9].mxu1 }
 0x62f   : > { %v1016_v0 = vpop.f32.mrb[10].mxu1 }
 0x630   : > { %v1071_v2 = vadd.f32 %v1070_v60, %v1061_v62  ;;  %v1064_v3 = vadd.f32 %v1063_v11, %v1016_v0  ;;  %v2909_v4 = vpop.f32.mrb[11].mxu1  ;;  %v3156_v62 = vld [vmem:[%s3956_s7 + $0x18] sm:$0xff]  }
 0x631   : > { %v3157_v4 = vld [vmem:[%s3956_s7 + $0x20] sm:$0xff]  }
 0x632   : > { %v1072_v5 = vadd.f32 %v1070_v60, %v1064_v3  ;;  %v1073_v6 = vadd.f32 %v1071_v2, %v3461_v35 }
 0x634   : > { %v1075_v7 = vsel %vm565_vm6, %v1073_v6, 0.0  ;;  %v1074_v8 = vadd.f32 %v1072_v5, %v3464_v36  ;;  %v3153_v36 = vld [vmem:[%s3956_s7] sm:$0xff]  }
 0x635   : > { %1076 = vadd.xlane.f32.xlu1 %v1075_v7  ;;  %2917 = vmatpush3.bf16.msra.mxu1 %v3153_v36 }
 0x636   : > { %v1078_v9 = vsel %vm565_vm6, %v1074_v8, 0.0  ;;  %2918 = vmatprep.subr.bf16.mxu1 %v3248_v1 }
 0x637   : > { %1079 = vadd.xlane.f32.xlu0 %v1078_v9  ;;  %v3161_v9 = vld [vmem:[%s3957_s8 + $0x10] sm:$0xff]  }
 0x639   : > { %2919 = vmatpush3.bf16.msra.mxu1 %v3154_v27 }
 0x63a   : > { %2924 = vmatprep.subr.bf16.mxu1 %v3248_v1 }
 0x6c2   : > { %v1077_v10 = vpop.xlane.xlu1 %1076 }
 0x6c3   : > { %v1082_v13 = vmul.f32 0.03125, %v1077_v10  ;;  %v3162_v10 = vld [vmem:[%s3957_s8 + $0x18] sm:$0xff]  }
 0x6c4   : > { %v1080_v16 = vpop.xlane.xlu0 %1079 }
 0x6c5   : > { %v1084_v18 = vsub.f32 %v1073_v6, %v1082_v13  ;;  %v1083_v19 = vmul.f32 0.03125, %v1080_v16  ;;  %v3158_v6 = vld [vmem:[%s3956_s7 + $0x28] sm:$0xff]   ;;  %v1229_v13 = vrot.slane %v3474_v37, %v3352_v14 }
 0x6c7   : > { %v1085_v20 = vsub.f32 %v1074_v8, %v1083_v19  ;;  %v1086_v23 = vmul.f32 %v1084_v18, %v1084_v18  ;;  %v3160_v8 = vld [vmem:[%s3957_s8 + $0x8] sm:$0xff]  }
 0x6c8   : > { %2943 = vmatpush3.bf16.msra.mxu0 %v3160_v8 }
 0x6c9   : > { %v1088_v25 = vsel %vm565_vm6, %v1086_v23, 0.0  ;;  %v1087_v26 = vmul.f32 %v1085_v20, %v1085_v20  ;;  %2944 = vmatprep.subr.bf16.mxu0 %v3248_v1 }
 0x6ca   : > { %1089 = vadd.xlane.f32.xlu0 %v1088_v25 }
 0x6cb   : > { %v1091_v35 = vsel %vm565_vm6, %v1087_v26, 0.0 }
 0x6cc   : > { %1092 = vadd.xlane.f32.xlu1 %v1091_v35  ;;  %2945 = vmatpush3.bf16.msra.mxu0 %v3161_v9 }
 0x6cd   : > { %2946 = vmatprep.subr.bf16.mxu0 %v3248_v1 }
 0x6d0   : > { %2947 = vmatpush3.bf16.msra.mxu0 %v3162_v10 }
 0x6d1   : > { %2952 = vmatprep.subr.bf16.mxu0 %v3248_v1 }
 0x757   : > { %v1090_v30 = vpop.xlane.xlu0 %1089 }
 0x758   : > { %v1094_v31 = vmul.f32 0.03125, %v1090_v30 }
 0x759   : > { %v1093_v32 = vpop.xlane.xlu1 %1092 }
 0x75a   : > { %v1096_v34 = vadd.f32 1e-05, %v1094_v31  ;;  %v1095_v15 = vmul.f32 0.03125, %v1093_v32 }
 0x75c   : > { %3207 = vrsqrt.f32 %v1096_v34  ;;  %v1097_v38 = vadd.f32 1e-05, %v1095_v15 }
 0x75e   : > { %3209 = vrsqrt.f32 %v1097_v38 }
 0x766   : > { %v3208_v43 = vpop.eup %3207 }
 0x767   : > { %v1100_v45 = vmul.f32 %v3208_v43, %v1084_v18 }
 0x768   : > { %v3210_v46 = vpop.eup %3209 }
 0x769   : > { %v1106_v48 = vmul.f32 %v1105_v41, %v1100_v45  ;;  %v1101_v49 = vmul.f32 %v3210_v46, %v1085_v20  ;;  %v3163_v45 = vld [vmem:[%s3957_s8 + $0x20] sm:$0xff]  }
 0x76b   : > { %v3563_v50 = vadd.f32 %v1111_v44, %v1106_v48  ;;  %v1107_v51 = vmul.f32 %v1105_v41, %v1101_v49 }
 0x76d   : > { %v1114_v47 = vmul.f32 %v3563_v50, %v3454_v24  ;;  %v3567_v52 = vadd.f32 %v1111_v44, %v1107_v51  ;;  %v3164_v51 = vld [vmem:[%s3957_s8 + $0x28] sm:$0xff]  }
 0x76f   : > { %v1115_v54 = vmul.f32 %v3567_v52, %v3457_v33  ;;  %v1152_v55 = vrot.slane %v1114_v47, 6  ;;  %v1163_v63 = vrot.slane %v1114_v47, 7 }
 0x771   : > { %v1153_v56 = vrot.slane %v1115_v54, 6  ;;  %v1164_v61 = vrot.slane %v1115_v54, 7  ;;  %v1291_v7 = vpack.c.bf16 %v1115_v54, %v1114_v47  ;;  %v3165_v47 = vld [vmem:[%s3957_s8 + $0x30] sm:$0xff]   ;;  %v3166_v54 = vld [vmem:[%s3957_s8 + $0x38] sm:$0xff]  }
 0x773   : > { %v1155_v57 = vsel %vm1154_vm9, %v1152_v55, %v1153_v56  ;;  %v1156_v58 = vsel %vm1154_vm9, %v1153_v56, %v1152_v55  ;;  %v1166_v0 = vsel %vm492_vm2, %v1164_v61, %v1163_v63  ;;  %v1165_v2 = vsel %vm492_vm2, %v1163_v63, %v1164_v61  ;;  %v3167_v55 = vld [vmem:[%s3957_s8 + $0x40] sm:$0xff]   ;;  %v3168_v56 = vld [vmem:[%s3957_s8 + $0x48] sm:$0xff]  }
 0x774   : > { %v1161_v11 = vsel %vm407_vm10, %v1156_v58, 0.0  ;;  %v1167_v3 = vsel %vm405_vm3, %v1166_v0, 0.0  ;;  %v3170_v58 = vld [vmem:[%s3957_s8 + $0x58] sm:$0xff]  }
 0x775   : > { %v1169_v60 = vpack.c.bf16 %v1155_v57, %v1161_v11  ;;  %v1232_v5 = vpack.c.bf16 %v1165_v2, %v1167_v3  ;;  %v3169_v57 = vld [vmem:[%s3957_s8 + $0x50] sm:$0xff]   ;;  %v1439_v11 = vrot.slane %v3474_v37, %v3367_v22 }
 0x777   : > { %2921 = vmatmul.mubr.msk.bf16.vlgmr.msra.gmra.mrb[12].mxu1 %vm565_vm6, %v1169_v60 }
 0x778   : > { %2925 = vmatpush3.bf16.msra.mxu1 %v3155_v59  ;;  %2928 = vmatprep.mubr.msk.bf16.mxu1 %vm3249_vm0, %v3248_v1 }
 0x779   : > { %2926 = vmatprep.subr.bf16.mxu1 %v3248_v1 }
 0x77c   : > { %2927 = vmatpush3.bf16.msra.mxu1 %v3156_v62 }
 0x77d   : > { %2932 = vmatprep.subr.bf16.mxu1 %v3248_v1 }
 0x783   : > { %2929 = vmatmul.mubr.msk.bf16.vlgmr.msra.gmra.mrb[12].mxu1 %vm565_vm6, %v1232_v5 }
 0x784   : > { %2933 = vmatpush3.bf16.msra.mxu1 %v3157_v4  ;;  %2936 = vmatprep.mubr.msk.bf16.mxu1 %vm3249_vm0, %v3248_v1 }
 0x785   : > { %2934 = vmatprep.subr.bf16.mxu1 %v3248_v1 }
 0x788   : > { %2935 = vmatpush3.bf16.msra.mxu1 %v3158_v6 }
 0x789   : > { %2976 = vmatprep.subr.bf16.mxu1 %v3248_v1 }
 0x78f   : > { %2937 = vmatmul.mubr.msk.bf16.vlgmr.msra.gmra.mrb[12].mxu1 %vm565_vm6, %v1291_v7 }
 0x790   : > { %2980 = vmatprep.mubr.msk.bf16.mxu1 %vm3249_vm0, %v3248_v1 }
 0x862   : > { %v1341_v16 = vpop.f32.mrb[12].mxu1 }
 0x863   : > { %v3078_v18 = vadd.f32 %v1341_v16, %v1229_v13  ;;  %v2938_v19 = vpop.f32.mrb[13].mxu1 }
 0x864   : > { %v1344_v20 = vpop.f32.mrb[14].mxu1 }
 0x865   : > { %v1350_v23 = vmax.f32 %v3078_v18, 0.0  ;;  %v3079_v25 = vadd.f32 %v1344_v20, %v1229_v13  ;;  %v2939_v26 = vpop.f32.mrb[15].mxu1 }
 0x867   : > { %v1352_v35 = vmul.f32 %v1350_v23, %v3454_v24  ;;  %v1351_v36 = vmax.f32 %v3079_v25, 0.0  ;;  %v3172_v25 = vld [vmem:[%s3955_s6 + $0x18] sm:$0xff]  }
 0x869   : > { %v1353_v27 = vmul.f32 %v1351_v36, %v3457_v33  ;;  %v1354_v29 = vrot.slane %v1352_v35, 6  ;;  %v1360_v30 = vrot.slane %v1352_v35, 7 }
 0x86b   : > { %v1355_v31 = vrot.slane %v1353_v27, 6  ;;  %v1361_v32 = vrot.slane %v1353_v27, 7  ;;  %v1513_v34 = vpack.c.bf16 %v1353_v27, %v1352_v35 }
 0x86d   : > { %v1356_v15 = vsel %vm1154_vm9, %v1354_v29, %v1355_v31  ;;  %v1357_v38 = vsel %vm1154_vm9, %v1355_v31, %v1354_v29  ;;  %v1362_v41 = vsel %vm492_vm2, %v1360_v30, %v1361_v32  ;;  %v1363_v43 = vsel %vm492_vm2, %v1361_v32, %v1360_v30 }
 0x86e   : > { %v1358_v44 = vsel %vm407_vm10, %v1357_v38, 0.0  ;;  %v1364_v46 = vsel %vm405_vm3, %v1363_v43, 0.0  ;;  %v1617_v31 = vrot.slane %v3474_v37, %v3362_v17  ;;  %v1622_v32 = vsub.s32 7, %v3349_v12  ;;  %v3239_v12 = vld [vmem:[%s3954_s5] sm:$0xff] }
 0x86f   : > { %v1366_v48 = vpack.c.bf16 %v1356_v15, %v1358_v44  ;;  %v1442_v49 = vpack.c.bf16 %v1362_v41, %v1364_v46 }
 0x870   : > { %v1623_v44 = vrot.slane %v3474_v37, %v1622_v32 }
 0x871   : > { %2949 = vmatmul.mubr.msk.bf16.vlgmr.msra.gmra.mrb[16].mxu0 %vm1391_vm11, %v1366_v48 }
 0x872   : > { %2953 = vmatpush3.bf16.msra.mxu0 %v3163_v45  ;;  %2960 = vmatprep.mubr.msk.bf16.mxu0 %vm3249_vm0, %v3248_v1 }
 0x873   : > { %2954 = vmatprep.subr.bf16.mxu0 %v3248_v1 }
 0x876   : > { %2955 = vmatpush3.bf16.msra.mxu0 %v3164_v51  ;;  %v3715_v51 = vld [vmem:[%s3954_s5 + $0x10] sm:$0xff] }
 0x877   : > { %2956 = vmatprep.subr.bf16.mxu0 %v3248_v1  ;;  %v1635_v37 = vrot.slane %v3715_v51, %v3398_v42 }
 0x87a   : > { %2957 = vmatpush3.bf16.msra.mxu0 %v3165_v47 }
 0x87b   : > { %2958 = vmatprep.subr.bf16.mxu0 %v3248_v1 }
 0x87e   : > { %2959 = vmatpush3.bf16.msra.mxu0 %v3166_v54 }
 0x87f   : > { %2964 = vmatprep.subr.bf16.mxu0 %v3248_v1 }
 0x881   : > { %2961 = vmatmul.mubr.msk.bf16.vlgmr.msra.gmra.mrb[16].mxu0 %vm1391_vm11, %v1442_v49 }
 0x882   : > { %2965 = vmatpush3.bf16.msra.mxu0 %v3167_v55  ;;  %2972 = vmatprep.mubr.msk.bf16.mxu0 %vm3249_vm0, %v3248_v1 }
 0x883   : > { %2966 = vmatprep.subr.bf16.mxu0 %v3248_v1 }
 0x886   : > { %2967 = vmatpush3.bf16.msra.mxu0 %v3168_v56 }
 0x887   : > { %2968 = vmatprep.subr.bf16.mxu0 %v3248_v1 }
 0x88a   : > { %2969 = vmatpush3.bf16.msra.mxu0 %v3169_v57 }
 0x88b   : > { %2970 = vmatprep.subr.bf16.mxu0 %v3248_v1 }
 0x88e   : > { %2971 = vmatpush3.bf16.msra.mxu0 %v3170_v58 }
 0x88f   : > { %3002 = vmatprep.subr.bf16.mxu0 %v3248_v1 }
 0x891   : > { %2973 = vmatmul.mubr.msk.bf16.vlgmr.msra.gmra.mrb[16].mxu0 %vm1391_vm11, %v1513_v34 }
 0x892   : > { %3004 = vmatprep.mubr.msk.bf16.mxu0 %vm3249_vm0, %v3248_v1 }
 0x964   : > { %v1575_v59 = vpop.f32.mrb[16].mxu0 }
 0x965   : > { %v3080_v60 = vadd.f32 %v1575_v59, %v1439_v11  ;;  %v2974_v61 = vpop.f32.mrb[17].mxu0 }
 0x966   : > { %v1578_v62 = vpop.f32.mrb[18].mxu0 }
 0x967   : > { %v1584_v63 = vmul.f32 %v3080_v60, %v3454_v24  ;;  %v3081_v0 = vadd.f32 %v1578_v62, %v1439_v11  ;;  %v2975_v2 = vpop.f32.mrb[19].mxu0 }
 0x969   : > { %v1585_v3 = vmul.f32 %v3081_v0, %v3457_v33  ;;  %v1586_v4 = vadd.f32 %v1584_v63, %v3563_v50 }
 0x96b   : > { %v1588_v5 = vsel %vm565_vm6, %v1586_v4, 0.0  ;;  %v1587_v6 = vadd.f32 %v1585_v3, %v3567_v52  ;;  %v3171_v52 = vld [vmem:[%s3955_s6 + $0x10] sm:$0xff]  }
 0x96c   : > { %1589 = vadd.xlane.f32.xlu0 %v1588_v5  ;;  %2977 = vmatpush3.bf16.msra.mxu1 %v3171_v52 }
 0x96d   : > { %v1591_v7 = vsel %vm565_vm6, %v1587_v6, 0.0  ;;  %2978 = vmatprep.subr.bf16.mxu1 %v3248_v1 }
 0x96e   : > { %1592 = vadd.xlane.f32.xlu1 %v1591_v7 }
 0x970   : > { %2979 = vmatpush3.bf16.msra.mxu1 %v3172_v25 }
 0x971   : > { %2984 = vmatprep.subr.bf16.mxu1 %v3248_v1 }
 0x9f9   : > { %v1590_v8 = vpop.xlane.xlu0 %1589 }
 0x9fa   : > { %v1594_v9 = vmul.f32 0.03125, %v1590_v8 }
 0x9fb   : > { %v1593_v10 = vpop.xlane.xlu1 %1592 }
 0x9fc   : > { %v1596_v13 = vsub.f32 %v1586_v4, %v1594_v9  ;;  %v1595_v16 = vmul.f32 0.03125, %v1593_v10 }
 0x9fe   : > { %v1597_v18 = vsub.f32 %v1587_v6, %v1595_v16  ;;  %v1598_v19 = vmul.f32 %v1596_v13, %v1596_v13 }
 0xa00   : > { %v1600_v20 = vsel %vm565_vm6, %v1598_v19, 0.0  ;;  %v1599_v23 = vmul.f32 %v1597_v18, %v1597_v18 }
 0xa01   : > { %1601 = vadd.xlane.f32.xlu0 %v1600_v20 }
 0xa02   : > { %v1603_v50 = vsel %vm565_vm6, %v1599_v23, 0.0 }
 0xa03   : > { %1604 = vadd.xlane.f32.xlu1 %v1603_v50 }
 0xa8e   : > { %v1602_v26 = vpop.xlane.xlu0 %1601 }
 0xa8f   : > { %v1606_v35 = vmul.f32 0.03125, %v1602_v26 }
 0xa90   : > { %v1605_v36 = vpop.xlane.xlu1 %1604 }
 0xa91   : > { %v1608_v27 = vadd.f32 1e-05, %v1606_v35  ;;  %v1607_v29 = vmul.f32 0.03125, %v1605_v36 }
 0xa93   : > { %3211 = vrsqrt.f32 %v1608_v27  ;;  %v1609_v30 = vadd.f32 1e-05, %v1607_v29 }
 0xa95   : > { %3213 = vrsqrt.f32 %v1609_v30 }
 0xa9d   : > { %v3212_v34 = vpop.eup %3211 }
 0xa9e   : > { %v1612_v15 = vmul.f32 %v3212_v34, %v1596_v13 }
 0xa9f   : > { %v3214_v38 = vpop.eup %3213 }
 0xaa0   : > { %v1618_v41 = vmul.f32 %v1617_v31, %v1612_v15  ;;  %v1613_v43 = vmul.f32 %v3214_v38, %v1597_v18 }
 0xaa2   : > { %v1619_v45 = vmul.f32 %v1617_v31, %v1613_v43  ;;  %v3703_v46 = vadd.f32 %v1623_v44, %v1618_v41 }
 0xaa4   : > { %v3705_v48 = vadd.f32 %v1623_v44, %v1619_v45 }
 0xaa6   : > { %v1631_v49 = vpack.c.bf16 %v3705_v48, %v3703_v46 }
 0xaa8   : > { %2981 = vmatmul.mubr.msk.bf16.vlgmr.msra.gmra.mrb[16].mxu1 %vm565_vm6, %v1631_v49 }
 0xaa9   : > { %2986 = vmatprep.mubr.msk.bf16.mxu1 %vm3249_vm0, %v3248_v1 }
 0xb7b   : > { %v1685_v47 = vpop.f32.mrb[16].mxu1 }
 0xb7c   : > { %v2982_v54 = vpop.f32.mrb[17].mxu1  ;;  %v1686_v56 = vadd.f32 %v1685_v47, %v1635_v37 }
 0xb7d   : > { %v1688_v55 = vpop.f32.mrb[18].mxu1 }
 0xb7e   : > { %v1689_v57 = vadd.f32 %v1688_v55, %v1635_v37  ;;  %v2983_v58 = vpop.f32.mrb[19].mxu1 }
 0xb80   : > { %v3719_v11 = vpack.c.bf16 %v1689_v57, %v1686_v56 }
 0xb82   : > { %1770 = vrot.lane.b32.xlu1 %v3719_v11, %s3251_s27  ;;  %1694 = vrot.lane.b32.xlu0 %v3719_v11, %s3252_s28 }
 0xb86   : > { %1768 = vrot.lane.b32.xlu1 %v3719_v11, %s3253_s29 }
 0xbf4   : > { %v1695_v59 = vpop.permute.xlu0 %1694  ;;  %v1771_v60 = vpop.permute.xlu1 %1770 }
 0xbf5   : > { %v1700_v42 = vsel %vm424_vm1, %v1695_v59, 0  ;;  %v1776_v61 = vsel %vm424_vm1, %v1771_v60, 0 }
 0xbf6   : > { %2985 = vmatpush3.bf16.xpose.msra.mxu1 %v1700_v42 }
 0xbf7   : > { %2990 = vmatprep.subr.bf16.mxu1 %v3248_v1 }
 0xbf8   : > { %v1769_v62 = vpop.permute.xlu1 %1768 }
 0xbfd   : > { %2987 = vmatmul.mubr.msk.bf16.vlgmr.msra.gmra.mrb[20].mxu1 %vm424_vm1, %v3719_v11 }
 0xbfe   : > { %2991 = vmatpush3.bf16.xpose.msra.mxu1 %v1776_v61  ;;  %2992 = vmatprep.mubr.msk.bf16.mxu1 %vm3249_vm0, %v3248_v1 }
 0xbff   : > { %2996 = vmatprep.subr.bf16.mxu1 %v3248_v1 }
 0xc05   : > { %2993 = vmatmul.mubr.msk.bf16.vlgmr.msra.gmra.mrb[24].mxu1 %vm424_vm1, %v1769_v62 }
 0xc06   : > { %2998 = vmatprep.mubr.msk.bf16.mxu1 %vm3249_vm0, %v3248_v1 }
 0xcd0   : > { %v1736_v63 = vpop.f32.mrb[20].mxu1 }
 0xcd1   : > { %v1743_v0 = vsel %vm413_vm7, %v1736_v63, -10000.0  ;;  %v2988_v2 = vpop.f32.mrb[21].mxu1 }
 0xcd2   : > { %v1739_v3 = vpop.f32.mrb[22].mxu1  ;;  %v1745_v4 = vsel %vm424_vm1, %v1743_v0, -inf }
 0xcd3   : > { %v1744_v5 = vsel %vm414_vm8, %v1739_v3, -10000.0  ;;  %1746 = vmax.xlane.f32.xlu0 %v1745_v4  ;;  %v2989_v6 = vpop.f32.mrb[23].mxu1 }
 0xcd4   : > { %v1748_v7 = vsel %vm424_vm1, %v1744_v5, -inf  ;;  %v1941_v6 = vrot.slane %v3715_v51, %v3387_v39 }
 0xcd5   : > { %1749 = vmax.xlane.f32.xlu1 %v1748_v7 }
 0xcd8   : > { %v1812_v8 = vpop.f32.mrb[24].mxu1 }
 0xcd9   : > { %v1819_v9 = vsel %vm413_vm7, %v1812_v8, -10000.0  ;;  %v2994_v10 = vpop.f32.mrb[25].mxu1 }
 0xcda   : > { %v1815_v13 = vpop.f32.mrb[26].mxu1  ;;  %v1821_v16 = vsel %vm424_vm1, %v1819_v9, -inf }
 0xcdb   : > { %v1820_v18 = vsel %vm414_vm8, %v1815_v13, -10000.0  ;;  %1822 = vmax.xlane.f32.xlu0 %v1821_v16  ;;  %v2995_v19 = vpop.f32.mrb[27].mxu1 }
 0xcdc   : > { %v1824_v20 = vsel %vm424_vm1, %v1820_v18, -inf }
 0xcdf   : > { %1825 = vmax.xlane.f32.xlu0 %v1824_v20 }
 0xd60   : > { %v1747_v23 = vpop.xlane.xlu0 %1746 }
 0xd61   : > { %v1751_v50 = vsub.f32 %v1743_v0, %v1747_v23 }
 0xd62   : > { %v1750_v52 = vpop.xlane.xlu1 %1749 }
 0xd63   : > { %v1753_v25 = vmul.f32 1.442695, %v1751_v50  ;;  %v1752_v26 = vsub.f32 %v1744_v5, %v1750_v52 }
 0xd65   : > { %3215 = vpow2.f32 %v1753_v25  ;;  %v1755_v35 = vmul.f32 1.442695, %v1752_v26 }
 0xd67   : > { %3217 = vpow2.f32 %v1755_v35 }
 0xd68   : > { %v1823_v36 = vpop.xlane.xlu0 %1822 }
 0xd69   : > { %v1827_v27 = vsub.f32 %v1819_v9, %v1823_v36 }
 0xd6b   : > { %v1829_v29 = vmul.f32 1.442695, %v1827_v27 }
 0xd6c   : > { %v1826_v30 = vpop.xlane.xlu0 %1825 }
 0xd6d   : > { %3219 = vpow2.f32 %v1829_v29  ;;  %v1828_v28 = vsub.f32 %v1820_v18, %v1826_v30 }
 0xd6f   : > { %v3216_v53 = vpop.eup %3215  ;;  %v1831_v31 = vmul.f32 1.442695, %v1828_v28 }
 0xd70   : > { %v1757_v34 = vsel %vm424_vm1, %v3216_v53, 0.0 }
 0xd71   : > { %v3218_v15 = vpop.eup %3217  ;;  %3221 = vpow2.f32 %v1831_v31  ;;  %1758 = vadd.xlane.f32.xlu1 %v1757_v34  ;;  %v3179_v31 = vld [vmem:[%s3957_s8 + $0x60] sm:$0xff]  }
 0xd72   : > { %v1760_v38 = vsel %vm424_vm1, %v3218_v15, 0.0 }
 0xd73   : > { %1761 = vadd.xlane.f32.xlu0 %v1760_v38 }
 0xd77   : > { %v3220_v41 = vpop.eup %3219 }
 0xd78   : > { %v1833_v43 = vsel %vm424_vm1, %v3220_v41, 0.0 }
 0xd79   : > { %1834 = vadd.xlane.f32.xlu1 %v1833_v43 }
 0xd7b   : > { %v3222_v44 = vpop.eup %3221 }
 0xd7c   : > { %v1836_v45 = vsel %vm424_vm1, %v3222_v44, 0.0 }
 0xd7d   : > { %1837 = vadd.xlane.f32.xlu0 %v1836_v45  ;;  %v1975_v45 = vrot.slane %v3715_v51, %v3450_v21 }
 0xd8a   : > { %1844 = vrot.lane.b32.xlu1 %v3719_v11, %s3255_s11 }
 0xd93   : > { %1891 = vrot.lane.b32.xlu0 %v3719_v11, %s3254_s10 }
 0xdfe   : > { %v1759_v49 = vpop.xlane.xlu1 %1758 }
 0xdff   : > { %3223 = vrcp.f32 %v1759_v49 }
 0xe00   : > { %v1762_v37 = vpop.xlane.xlu0 %1761 }
 0xe01   : > { %3225 = vrcp.f32 %v1762_v37  ;;  %v1981_v37 = vrot.slane %v3715_v51, %v3557_v40 }
 0xe06   : > { %v1835_v47 = vpop.xlane.xlu1 %1834 }
 0xe07   : > { %3227 = vrcp.f32 %v1835_v47 }
 0xe09   : > { %v3224_v54 = vpop.eup %3223 }
 0xe0a   : > { %v1845_v55 = vpop.permute.xlu1 %1844  ;;  %v1838_v56 = vpop.xlane.xlu0 %1837  ;;  %v1765_v59 = vmul.f32 %v3224_v54, %v3216_v53  ;;  %v3174_v53 = vld [vmem:[%s3956_s7 + $0x38] sm:$0xff]  }
 0xe0b   : > { %v3226_v57 = vpop.eup %3225  ;;  %3229 = vrcp.f32 %v1838_v56  ;;  %2997 = vmatpush3.bf16.msra.mxu1 %v1845_v55 }
 0xe0c   : > { %v1766_v58 = vmul.f32 %v3226_v57, %v3218_v15  ;;  %3008 = vmatprep.subr.bf16.mxu1 %v3248_v1 }
 0xe0e   : > { %v1892_v42 = vpop.permute.xlu0 %1891  ;;  %v1767_v60 = vpack.c.bf16 %v1766_v58, %v1765_v59 }
 0xe0f   : > { %3003 = vmatpush3.bf16.msra.mxu0 %v1892_v42 }
 0xe10   : > { %3032 = vmatprep.subr.bf16.mxu0 %v3248_v1 }
 0xe11   : > { %v3228_v11 = vpop.eup %3227 }
 0xe12   : > { %3005 = vmatmul.mubr.msk.bf16.vlgmr.msra.gmra.mrb[20].mxu0 %vm424_vm1, %v1767_v60  ;;  %v1841_v62 = vmul.f32 %v3228_v11, %v3220_v41 }
 0xe13   : > { %3040 = vmatprep.mubr.msk.bf16.mxu0 %vm3249_vm0, %v3248_v1  ;;  %3033 = vmatpush3.bf16.msra.mxu0 %v3179_v31 }
 0xe14   : > { %3034 = vmatprep.subr.bf16.mxu0 %v3248_v1 }
 0xe15   : > { %v3230_v61 = vpop.eup %3229 }
 0xe16   : > { %v1842_v63 = vmul.f32 %v3230_v61, %v3222_v44 }
 0xe18   : > { %v1843_v0 = vpack.c.bf16 %v1842_v63, %v1841_v62 }
 0xe1a   : > { %2999 = vmatmul.mubr.msk.bf16.vlgmr.msra.gmra.mrb[28].mxu1 %vm424_vm1, %v1843_v0  ;;  %v3175_v0 = vld [vmem:[%s3956_s7 + $0x40] sm:$0xff]  }
 0xe1b   : > { %3012 = vmatprep.mubr.msk.bf16.mxu1 %vm3249_vm0, %v3248_v1 }
 0xee5   : > { %v1931_v2 = vpop.f32.mrb[20].mxu0 }
 0xee6   : > { %v3006_v3 = vpop.f32.mrb[21].mxu0 }
 0xee7   : > { %v1934_v4 = vpop.f32.mrb[22].mxu0 }
 0xee8   : > { %v3007_v5 = vpop.f32.mrb[23].mxu0 }
 0xeed   : > { %v1884_v7 = vpop.f32.mrb[28].mxu1 }
 0xeee   : > { %v1932_v8 = vadd.f32 %v1931_v2, %v1884_v7  ;;  %v3000_v9 = vpop.f32.mrb[29].mxu1 }
 0xeef   : > { %v1887_v10 = vpop.f32.mrb[30].mxu1  ;;  %v3177_v9 = vld [vmem:[%s3956_s7 + $0x50] sm:$0xff]  }
 0xef0   : > { %v1942_v13 = vadd.f32 %v1941_v6, %v1932_v8  ;;  %v1935_v16 = vadd.f32 %v1934_v4, %v1887_v10  ;;  %v3001_v18 = vpop.f32.mrb[31].mxu1  ;;  %v3176_v4 = vld [vmem:[%s3956_s7 + $0x48] sm:$0xff]  }
 0xef1   : > { %v3180_v18 = vld [vmem:[%s3957_s8 + $0x68] sm:$0xff]  }
 0xef2   : > { %v1943_v19 = vadd.f32 %v1941_v6, %v1935_v16  ;;  %v1944_v20 = vadd.f32 %v1942_v13, %v3703_v46  ;;  %v3178_v13 = vld [vmem:[%s3956_s7 + $0x58] sm:$0xff]   ;;  %3035 = vmatpush3.bf16.msra.mxu0 %v3180_v18 }
 0xef3   : > { %3036 = vmatprep.subr.bf16.mxu0 %v3248_v1 }
 0xef4   : > { %v1946_v23 = vsel %vm565_vm6, %v1944_v20, 0.0  ;;  %v1945_v50 = vadd.f32 %v1943_v19, %v3705_v48  ;;  %v3173_v48 = vld [vmem:[%s3956_s7 + $0x30] sm:$0xff]  }
 0xef5   : > { %1947 = vadd.xlane.f32.xlu1 %v1946_v23  ;;  %3009 = vmatpush3.bf16.msra.mxu1 %v3173_v48  ;;  %v3181_v19 = vld [vmem:[%s3957_s8 + $0x70] sm:$0xff]   ;;  %v2096_v23 = vrot.slane %v3715_v51, %v3352_v14 }
 0xef6   : > { %v1949_v52 = vsel %vm565_vm6, %v1945_v50, 0.0  ;;  %3010 = vmatprep.subr.bf16.mxu1 %v3248_v1  ;;  %3037 = vmatpush3.bf16.msra.mxu0 %v3181_v19 }
 0xef7   : > { %1950 = vadd.xlane.f32.xlu0 %v1949_v52  ;;  %3038 = vmatprep.subr.bf16.mxu0 %v3248_v1 }
 0xef9   : > { %3011 = vmatpush3.bf16.msra.mxu1 %v3174_v53 }
 0xefa   : > { %3016 = vmatprep.subr.bf16.mxu1 %v3248_v1 }
 0xf82   : > { %v1948_v25 = vpop.xlane.xlu1 %1947 }
 0xf83   : > { %v1952_v39 = vmul.f32 0.03125, %v1948_v25 }
 0xf84   : > { %v1951_v26 = vpop.xlane.xlu0 %1950 }
 0xf85   : > { %v1954_v35 = vsub.f32 %v1944_v20, %v1952_v39  ;;  %v1953_v36 = vmul.f32 0.03125, %v1951_v26  ;;  %v3182_v20 = vld [vmem:[%s3957_s8 + $0x78] sm:$0xff]  }
 0xf86   : > { %3039 = vmatpush3.bf16.msra.mxu0 %v3182_v20 }
 0xf87   : > { %v1955_v27 = vsub.f32 %v1945_v50, %v1953_v36  ;;  %v1956_v29 = vmul.f32 %v1954_v35, %v1954_v35  ;;  %3044 = vmatprep.subr.bf16.mxu0 %v3248_v1 }
 0xf89   : > { %v1958_v30 = vsel %vm565_vm6, %v1956_v29, 0.0  ;;  %v1957_v28 = vmul.f32 %v1955_v27, %v1955_v27 }
 0xf8a   : > { %1959 = vadd.xlane.f32.xlu1 %v1958_v30 }
 0xf8b   : > { %v1961_v46 = vsel %vm565_vm6, %v1957_v28, 0.0 }
 0xf8c   : > { %1962 = vadd.xlane.f32.xlu0 %v1961_v46 }
0x1017   : > { %v1960_v34 = vpop.xlane.xlu1 %1959 }
0x1018   : > { %v1964_v15 = vmul.f32 0.03125, %v1960_v34 }
0x1019   : > { %v1963_v38 = vpop.xlane.xlu0 %1962 }
0x101a   : > { %v1966_v41 = vadd.f32 1e-05, %v1964_v15  ;;  %v1965_v43 = vmul.f32 0.03125, %v1963_v38 }
0x101c   : > { %3231 = vrsqrt.f32 %v1966_v41  ;;  %v1967_v44 = vadd.f32 1e-05, %v1965_v43  ;;  %v3183_v43 = vld [vmem:[%s3957_s8 + $0x80] sm:$0xff]  }
0x101e   : > { %3233 = vrsqrt.f32 %v1967_v44 }
0x1026   : > { %v3232_v49 = vpop.eup %3231 }
0x1027   : > { %v1970_v47 = vmul.f32 %v3232_v49, %v1954_v35 }
0x1028   : > { %v3234_v54 = vpop.eup %3233 }
0x1029   : > { %v1976_v55 = vmul.f32 %v1975_v45, %v1970_v47  ;;  %v1971_v56 = vmul.f32 %v3234_v54, %v1955_v27  ;;  %v3185_v47 = vld [vmem:[%s3957_s8 + $0x90] sm:$0xff]   ;;  %v3186_v54 = vld [vmem:[%s3957_s8 + $0x98] sm:$0xff]  }
0x102b   : > { %v3794_v57 = vadd.f32 %v1981_v37, %v1976_v55  ;;  %v1977_v58 = vmul.f32 %v1975_v45, %v1971_v56  ;;  %v3187_v55 = vld [vmem:[%s3957_s8 + $0xa0] sm:$0xff]   ;;  %v3188_v56 = vld [vmem:[%s3957_s8 + $0xa8] sm:$0xff]  }
0x102d   : > { %v1984_v59 = vmul.f32 %v3794_v57, %v3454_v24  ;;  %v3798_v42 = vadd.f32 %v1981_v37, %v1977_v58  ;;  %v3184_v37 = vld [vmem:[%s3957_s8 + $0x88] sm:$0xff]   ;;  %v3189_v58 = vld [vmem:[%s3957_s8 + $0xb0] sm:$0xff]  }
0x102f   : > { %v1985_v60 = vmul.f32 %v3798_v42, %v3457_v33  ;;  %v2024_v21 = vrot.slane %v1984_v59, 6  ;;  %v2030_v5 = vrot.slane %v1984_v59, 7 }
0x1031   : > { %v2025_v11 = vrot.slane %v1985_v60, 6  ;;  %v2031_v3 = vrot.slane %v1985_v60, 7  ;;  %v2158_v16 = vpack.c.bf16 %v1985_v60, %v1984_v59  ;;  %v3190_v59 = vld [vmem:[%s3957_s8 + $0xb8] sm:$0xff]   ;;  %v2305_v60 = vrot.slane %v3715_v51, %v3367_v22 }
0x1033   : > { %v2026_v61 = vsel %vm1154_vm9, %v2024_v21, %v2025_v11  ;;  %v2027_v62 = vsel %vm1154_vm9, %v2025_v11, %v2024_v21  ;;  %v2033_v6 = vsel %vm492_vm2, %v2031_v3, %v2030_v5  ;;  %v2032_v7 = vsel %vm492_vm2, %v2030_v5, %v2031_v3 }
0x1034   : > { %v2028_v63 = vsel %vm407_vm10, %v2027_v62, 0.0  ;;  %v2034_v8 = vsel %vm405_vm3, %v2033_v6, 0.0 }
0x1035   : > { %v2036_v2 = vpack.c.bf16 %v2026_v61, %v2028_v63  ;;  %v2099_v10 = vpack.c.bf16 %v2032_v7, %v2034_v8 }
0x1037   : > { %3013 = vmatmul.mubr.msk.bf16.vlgmr.msra.gmra.mrb[32].mxu1 %vm565_vm6, %v2036_v2 }
0x1038   : > { %3017 = vmatpush3.bf16.msra.mxu1 %v3175_v0  ;;  %3020 = vmatprep.mubr.msk.bf16.mxu1 %vm3249_vm0, %v3248_v1 }
0x1039   : > { %3018 = vmatprep.subr.bf16.mxu1 %v3248_v1 }
0x103c   : > { %3019 = vmatpush3.bf16.msra.mxu1 %v3176_v4 }
0x103d   : > { %3024 = vmatprep.subr.bf16.mxu1 %v3248_v1 }
0x1043   : > { %3021 = vmatmul.mubr.msk.bf16.vlgmr.msra.gmra.mrb[32].mxu1 %vm565_vm6, %v2099_v10 }
0x1044   : > { %3025 = vmatpush3.bf16.msra.mxu1 %v3177_v9  ;;  %3028 = vmatprep.mubr.msk.bf16.mxu1 %vm3249_vm0, %v3248_v1 }
0x1045   : > { %3026 = vmatprep.subr.bf16.mxu1 %v3248_v1 }
0x1048   : > { %3027 = vmatpush3.bf16.msra.mxu1 %v3178_v13 }
0x1049   : > { %3068 = vmatprep.subr.bf16.mxu1 %v3248_v1 }
0x104f   : > { %3029 = vmatmul.mubr.msk.bf16.vlgmr.msra.gmra.mrb[32].mxu1 %vm565_vm6, %v2158_v16 }
0x1050   : > { %3072 = vmatprep.mubr.msk.bf16.mxu1 %vm3249_vm0, %v3248_v1 }
0x1122   : > { %v2208_v50 = vpop.f32.mrb[32].mxu1 }
0x1123   : > { %v3082_v52 = vadd.f32 %v2208_v50, %v2096_v23  ;;  %v3030_v25 = vpop.f32.mrb[33].mxu1 }
0x1124   : > { %v2211_v39 = vpop.f32.mrb[34].mxu1  ;;  %v401_v25 = vld [vmem:[%s3954_s5 + $0x30] sm:$0xff] }
0x1125   : > { %v2217_v26 = vmax.f32 %v3082_v52, 0.0  ;;  %v3083_v35 = vadd.f32 %v2211_v39, %v2096_v23  ;;  %v3031_v36 = vpop.f32.mrb[35].mxu1  ;;  %v399_v23 = vld [vmem:[%s3954_s5 + $0x20] sm:$0xff]  ;;  %v400_v52 = vld [vmem:[%s3954_s5 + $0x28] sm:$0xff] }
0x1126   : > { %v2496_v39 = vpack.c.bf16 %v401_v25, %v400_v52 }
0x1127   : > { %v2219_v27 = vmul.f32 %v2217_v26, %v3454_v24  ;;  %v2218_v29 = vmax.f32 %v3083_v35, 0.0 }
0x1129   : > { %v2220_v30 = vmul.f32 %v2218_v29, %v3457_v33  ;;  %v2221_v28 = vrot.slane %v2219_v27, 6  ;;  %v2227_v46 = vrot.slane %v2219_v27, 7 }
0x112b   : > { %v2222_v48 = vrot.slane %v2220_v30, 6  ;;  %v2228_v53 = vrot.slane %v2220_v30, 7  ;;  %v2379_v31 = vpack.c.bf16 %v2220_v30, %v2219_v27 }
0x112d   : > { %v2223_v14 = vsel %vm1154_vm9, %v2221_v28, %v2222_v48  ;;  %v2224_v34 = vsel %vm1154_vm9, %v2222_v48, %v2221_v28  ;;  %v2229_v15 = vsel %vm492_vm2, %v2227_v46, %v2228_v53  ;;  %v2230_v38 = vsel %vm492_vm2, %v2228_v53, %v2227_v46 }
0x112e   : > { %v2225_v41 = vsel %vm407_vm10, %v2224_v34, 0.0  ;;  %v2231_v44 = vsel %vm405_vm3, %v2230_v38, 0.0  ;;  %v2489_v46 = vrot.slane %v3715_v51, %v1622_v32 }
0x112f   : > { %v2233_v45 = vpack.c.bf16 %v2223_v14, %v2225_v41  ;;  %v2308_v49 = vpack.c.bf16 %v2229_v15, %v2231_v44 }
0x1131   : > { %3041 = vmatmul.mubr.msk.bf16.vlgmr.msra.gmra.mrb[24].mxu0 %vm1391_vm11, %v2233_v45 }
0x1132   : > { %3045 = vmatpush3.bf16.msra.mxu0 %v3183_v43  ;;  %3052 = vmatprep.mubr.msk.bf16.mxu0 %vm3249_vm0, %v3248_v1 }
0x1133   : > { %3046 = vmatprep.subr.bf16.mxu0 %v3248_v1 }
0x1136   : > { %3047 = vmatpush3.bf16.msra.mxu0 %v3184_v37 }
0x1137   : > { %3048 = vmatprep.subr.bf16.mxu0 %v3248_v1 }
0x113a   : > { %3049 = vmatpush3.bf16.msra.mxu0 %v3185_v47 }
0x113b   : > { %3050 = vmatprep.subr.bf16.mxu0 %v3248_v1 }
0x113e   : > { %3051 = vmatpush3.bf16.msra.mxu0 %v3186_v54 }
0x113f   : > { %3056 = vmatprep.subr.bf16.mxu0 %v3248_v1 }
0x1141   : > { %3053 = vmatmul.mubr.msk.bf16.vlgmr.msra.gmra.mrb[24].mxu0 %vm1391_vm11, %v2308_v49 }
0x1142   : > { %3057 = vmatpush3.bf16.msra.mxu0 %v3187_v55  ;;  %3064 = vmatprep.mubr.msk.bf16.mxu0 %vm3249_vm0, %v3248_v1 }
0x1143   : > { %3058 = vmatprep.subr.bf16.mxu0 %v3248_v1 }
0x1146   : > { %3059 = vmatpush3.bf16.msra.mxu0 %v3188_v56 }
0x1147   : > { %3060 = vmatprep.subr.bf16.mxu0 %v3248_v1 }
0x114a   : > { %3061 = vmatpush3.bf16.msra.mxu0 %v3189_v58 }
0x114b   : > { %3062 = vmatprep.subr.bf16.mxu0 %v3248_v1 }
0x114e   : > { %3063 = vmatpush3.bf16.msra.mxu0 %v3190_v59 }
0x1151   : > { %3065 = vmatmul.mubr.msk.bf16.vlgmr.msra.gmra.mrb[24].mxu0 %vm1391_vm11, %v2379_v31 }
0x1224   : > { %v2441_v21 = vpop.f32.mrb[24].mxu0 }
0x1225   : > { %v3084_v11 = vadd.f32 %v2441_v21, %v2305_v60  ;;  %v3066_v61 = vpop.f32.mrb[25].mxu0 }
0x1226   : > { %v2444_v62 = vpop.f32.mrb[26].mxu0 }
0x1227   : > { %v2450_v63 = vmul.f32 %v3084_v11, %v3454_v24  ;;  %v3085_v0 = vadd.f32 %v2444_v62, %v2305_v60  ;;  %v3067_v2 = vpop.f32.mrb[27].mxu0 }
0x1229   : > { %v2451_v3 = vmul.f32 %v3085_v0, %v3457_v33  ;;  %v2452_v4 = vadd.f32 %v2450_v63, %v3794_v57 }
0x122b   : > { %v2454_v5 = vsel %vm565_vm6, %v2452_v4, 0.0  ;;  %v2453_v6 = vadd.f32 %v2451_v3, %v3798_v42  ;;  %v398_v42 = vld [vmem:[%s3954_s5 + $0x18] sm:$0xff] }
0x122c   : > { %2455 = vadd.xlane.f32.xlu1 %v2454_v5  ;;  %v2495_v50 = vpack.c.bf16 %v399_v23, %v398_v42 }
0x122d   : > { %v2457_v7 = vsel %vm565_vm6, %v2453_v6, 0.0 }
0x122e   : > { %2458 = vadd.xlane.f32.xlu0 %v2457_v7  ;;  %3069 = vmatpush3.bf16.msra.mxu1 %v2495_v50 }
0x122f   : > { %3070 = vmatprep.subr.bf16.mxu1 %v3248_v1  ;;  %v2483_v1 = vrot.slane %v3715_v51, %v3362_v17  ;;  %v2500_v17 = vrot.slane %v3239_v12, %v3557_v40 }
0x1232   : > { %3071 = vmatpush3.bf16.msra.mxu1 %v2496_v39 }
0x12b9   : > { %v2456_v22 = vpop.xlane.xlu1 %2455 }
0x12ba   : > { %v2460_v8 = vmul.f32 0.03125, %v2456_v22 }
0x12bb   : > { %v2459_v9 = vpop.xlane.xlu0 %2458 }
0x12bc   : > { %v2462_v10 = vsub.f32 %v2452_v4, %v2460_v8  ;;  %v2461_v13 = vmul.f32 0.03125, %v2459_v9 }
0x12be   : > { %v2463_v16 = vsub.f32 %v2453_v6, %v2461_v13  ;;  %v2464_v18 = vmul.f32 %v2462_v10, %v2462_v10 }
0x12c0   : > { %v2466_v19 = vsel %vm565_vm6, %v2464_v18, 0.0  ;;  %v2465_v20 = vmul.f32 %v2463_v16, %v2463_v16 }
0x12c1   : > { %2467 = vadd.xlane.f32.xlu1 %v2466_v19 }
0x12c2   : > { %v2469_v57 = vsel %vm565_vm6, %v2465_v20, 0.0 }
0x12c3   : > { %2470 = vadd.xlane.f32.xlu0 %v2469_v57 }
0x134e   : > { %v2468_v26 = vpop.xlane.xlu1 %2467 }
0x134f   : > { %v2472_v35 = vmul.f32 0.03125, %v2468_v26 }
0x1350   : > { %v2471_v36 = vpop.xlane.xlu0 %2470 }
0x1351   : > { %v2474_v27 = vadd.f32 1e-05, %v2472_v35  ;;  %v2473_v29 = vmul.f32 0.03125, %v2471_v36 }
0x1353   : > { %3235 = vrsqrt.f32 %v2474_v27  ;;  %v2475_v30 = vadd.f32 1e-05, %v2473_v29 }
0x1355   : > { %3237 = vrsqrt.f32 %v2475_v30 }
0x135d   : > { %v3236_v28 = vpop.eup %3235 }
0x135e   : > { %v2478_v48 = vmul.f32 %v3236_v28, %v2462_v10 }
0x135f   : > { %v3238_v53 = vpop.eup %3237 }
0x1360   : > { %v2484_v31 = vmul.f32 %v2483_v1, %v2478_v48  ;;  %v2479_v14 = vmul.f32 %v3238_v53, %v2463_v16 }
0x1362   : > { %v2490_v34 = vadd.f32 %v2489_v46, %v2484_v31  ;;  %v2485_v15 = vmul.f32 %v2483_v1, %v2479_v14 }
0x1364   : > { %v2491_v38 = vadd.f32 %v2489_v46, %v2485_v15  ;;  %v2492_v41 = vmul.f32 %v2490_v34, %v3454_v24 }
0x1366   : > { %v2493_v43 = vmul.f32 %v2491_v38, %v3457_v33 }
0x1368   : > { %v2494_v44 = vpack.c.bf16 %v2493_v43, %v2492_v41 }
0x136a   : > { %3073 = vmatmul.mubr.msk.bf16.vlgmr.msra.gmra.mrb[36].mxu1 %vm565_vm6, %v2494_v44 }
0x143d   : > { %v2538_v32 = vpop.f32.mrb[36].mxu1 }
0x143e   : > { %v2539_v51 = vadd.f32 %v2538_v32, %v2500_v17  ;;  %v3074_v45 = vpop.f32.mrb[37].mxu1 }
0x143f   : > { %v2541_v49 = vpop.f32.mrb[38].mxu1 }
0x1440   : > { %v2545_v37 = vmul.f32 %v2539_v51, %v3454_v24  ;;  %v2542_v47 = vadd.f32 %v2541_v49, %v2500_v17  ;;  %v3075_v54 = vpop.f32.mrb[39].mxu1 }
0x1442   : > { %2547 = vst [vmem:[%s386_s18] sm:$0xff] %v2545_v37  ;;  %v2546_v55 = vmul.f32 %v2542_v47, %v3457_v33 }
0x1444   : > { %2548 = vst [vmem:[%s386_s18 + $0x8] sm:$0xff] %v2546_v55 }
0x1445 PF: > { %s19_s30 = sadd.s32 1, %s3246_s30  }
0x1446   : > { %p16_p4 = scmp.ge.s32.totalorder %s19_s30, 4  }
0x1448   :  { %18 = sbr.rel (!%p16_p4) target bundleno = 1 (0x1), region = 98 }

</bundles_post_ra>
